<compile_context>
chip_gen: v5e
topology: v5e:2x2
jax: 0.10.0
libtpu: 0.0.40
codegen_flags: <defaults>
</compile_context>

<pallas_src>
import math
import numpy as np
import jax
import jax.numpy as jnp
from jax.experimental import pallas as pl
from jax.experimental.pallas import tpu as pltpu

D_MODEL = 32
N_HEAD = 4
HEAD_DIM = D_MODEL // N_HEAD
DIM_FF = 2048          # nn.TransformerEncoderLayer default
LN_EPS = 1e-5


def _layer_norm(x, w, b):
    mean = jnp.mean(x, axis=-1, keepdims=True)
    var = jnp.mean((x - mean) ** 2, axis=-1, keepdims=True)
    return (x - mean) * jax.lax.rsqrt(var + LN_EPS) * w + b


def _make_kernel(bt, S):
    """Kernel closure over the batch-tile size and sequence length."""
    rows = bt * S
    NHS = N_HEAD * S          # tiled-key column count (32 when S=8)
    scale = 1.0 / math.sqrt(HEAD_DIM)

    def kernel(x_ref,
               wenc_ref, benc_ref,
               wqkv_ref, bqkv_ref,
               wout_ref, bout_ref,
               kvmask_ref, pmask_ref,
               ln1w_ref, ln1b_ref,
               w1_ref, b1_ref, w2_ref, b2_ref,
               ln2w_ref, ln2b_ref,
               o_ref):
        D = D_MODEL
        x = x_ref[...]                                          # (rows, D)

        # 1) self.enccoder : Linear(d_model, d_model)
        enc = (jnp.dot(x, wenc_ref[...], preferred_element_type=jnp.float32)
               + benc_ref[...])

        # 2) Multi-head self-attention (nhead=4), fused projections.
        qkv = (jnp.dot(enc, wqkv_ref[...], preferred_element_type=jnp.float32)
               + bqkv_ref[...])                                 # (rows, 3D)
        q = qkv[:, :D] * scale
        k = qkv[:, D:2 * D]
        v = qkv[:, 2 * D:]
        q3 = q.reshape(bt, S, D)
        k3 = k.reshape(bt, S, D)
        v3 = v.reshape(bt, S, D)

        # Block-diagonal-keys attention: tile K/V across heads along the key
        # axis and mask cross-head feature terms, so one (S,D)@(D,NH*S)
        # batched matmul produces ALL heads' scores for a sequence.
        kvmask = kvmask_ref[...]                                # (NH*S, D)
        km = jnp.concatenate([k3] * N_HEAD, axis=1) * kvmask    # (bt, NH*S, D)
        vm = jnp.concatenate([v3] * N_HEAD, axis=1) * kvmask

        s = jnp.einsum("bqc,bjc->bqj", q3, km,
                       preferred_element_type=jnp.float32)      # (bt, S, NH*S)

        # Per-head softmax. Global per-row max is used for stability; it is
        # shift-invariant within each head block (would only differ from the
        # exact per-head max if cross-head score ranges differ by >~88).
        m = jnp.max(s, axis=-1, keepdims=True)
        p = jnp.exp(s - m).reshape(rows, NHS)
        # Per-head denominators, broadcast back to columns via one mask matmul.
        lsum = jnp.dot(p, pmask_ref[...], preferred_element_type=jnp.float32)
        p = p * pl.reciprocal(jnp.maximum(lsum, 1e-30), approx=True)
        p3 = p.reshape(bt, S, NHS)

        o = jnp.einsum("bqi,bij->bqj", p3, vm,
                       preferred_element_type=jnp.float32)      # (bt, S, D)

        # Fused out-projection over the (already head-concatenated) output.
        attn = (jnp.dot(o.reshape(rows, D), wout_ref[...],
                        preferred_element_type=jnp.float32) + bout_ref[...])

        # 3) residual + LayerNorm 1 (post-norm). Dropout = identity (eval).
        y = _layer_norm(enc + attn, ln1w_ref[...], ln1b_ref[...])

        # 4) feed-forward (relu) in bf16 with f32 accumulation + residual + LN2
        h1 = jnp.maximum(
            jnp.dot(y.astype(jnp.bfloat16), w1_ref[...],
                    preferred_element_type=jnp.float32) + b1_ref[...], 0.0)
        ff = (jnp.dot(h1.astype(jnp.bfloat16), w2_ref[...],
                      preferred_element_type=jnp.float32) + b2_ref[...])
        z = _layer_norm(y + ff, ln2w_ref[...], ln2b_ref[...])

        o_ref[...] = z.astype(o_ref.dtype)

    return kernel


def _prepare_weights(p, S):
    """Kernel-layout params: matrices as (in, out); qkv kept packed (32, 96);
    feed-forward weights cast to bf16 (f32 accumulation in-kernel); plus the
    two static head-block masks used by the block-diagonal attention."""
    row_head_kv = jnp.arange(N_HEAD * S)[:, None] // S
    col_head_kv = jnp.arange(D_MODEL)[None, :] // HEAD_DIM
    kvmask = (row_head_kv == col_head_kv).astype(jnp.float32)     # (NH*S, D)
    row_head_p = jnp.arange(N_HEAD * S)[:, None] // S
    col_head_p = jnp.arange(N_HEAD * S)[None, :] // S
    pmask = (row_head_p == col_head_p).astype(jnp.float32)        # (NH*S, NH*S)

    return [
        p["w_enc"].T, p["b_enc"][None, :],
        p["w_in"].T, p["b_in"][None, :],              # packed qkv (32, 96)
        p["w_out"].T, p["b_out"][None, :],
        kvmask, pmask,
        p["ln1_w"][None, :], p["ln1_b"][None, :],
        p["w1"].T.astype(jnp.bfloat16), p["b1"][None, :],
        p["w2"].T.astype(jnp.bfloat16), p["b2"][None, :],
        p["ln2_w"][None, :], p["ln2_b"][None, :],
    ]


def _pick_tile(batch):
    """Per-generation batch-tile / scoped-VMEM choices (perf-review guidance)."""
    kind = ""
    try:
        kind = jax.devices()[0].device_kind.lower()
    except Exception:
        pass
    if "v5" in kind:
        # v5e scoped-VMEM default is 16 MiB; keep the working set small.
        cap, vmem = 64, 32 << 20
    elif "v6" in kind:
        # v6e: amortize the ~0.35us/step overhead with bigger tiles.
        cap, vmem = 256, 64 << 20
    elif "v7" in kind or "tpu7" in kind:
        # v7x: 64 MiB VMEM/TC and 2 TensorCores -> keep <=128 and >=2 steps.
        cap, vmem = 128, 32 << 20
        cap = min(cap, max(1, (batch + 1) // 2))
    else:
        cap, vmem = 128, 48 << 20
    return max(1, min(batch, cap)), vmem


def _build_call(rows_total, S, b_tile, weight_args, vmem_limit):
    def w_spec(w):
        nd = w.ndim
        return pl.BlockSpec(w.shape, lambda b, _n=nd: (0,) * _n)

    rows_blk = b_tile * S
    in_specs = [pl.BlockSpec((rows_blk, D_MODEL), lambda b: (b, 0))]
    in_specs += [w_spec(w) for w in weight_args]
    out_spec = pl.BlockSpec((rows_blk, D_MODEL), lambda b: (b, 0))

    return pl.pallas_call(
        _make_kernel(b_tile, S),
        out_shape=jax.ShapeDtypeStruct((rows_total, D_MODEL), jnp.float32),
        grid_spec=pltpu.PrefetchScalarGridSpec(
            num_scalar_prefetch=0,
            grid=(rows_total // rows_blk,),
            in_specs=in_specs,
            out_specs=out_spec,
        ),
        compiler_params=pltpu.CompilerParams(
            dimension_semantics=("parallel",),
            vmem_limit_bytes=vmem_limit),
    )


def trans_backbone_pallas(x, p, b_tile=None):
    """x: [B, S, D_MODEL] float32; p: params in PyTorch (out, in) convention."""
    B, S, D = x.shape
    assert D == D_MODEL

    auto_tile, vmem_limit = _pick_tile(B)
    if b_tile is None:
        b_tile = auto_tile

    B_pad = int(pl.cdiv(B, b_tile)) * b_tile
    if B_pad != B:
        x = jnp.pad(x, ((0, B_pad - B), (0, 0), (0, 0)))

    # Pre-flatten rows on the (free) XLA side so the kernel does no I/O reshape.
    x2 = x.reshape(B_pad * S, D)
    weight_args = _prepare_weights(p, S)
    call = _build_call(B_pad * S, S, b_tile, weight_args, vmem_limit)
    out = call(x2, *weight_args)
    return out.reshape(B_pad, S, D)[:B]


def init_params(key):
    """Deterministic synthetic parameters matching nn.Module shapes."""
    ks = jax.random.split(key, 8)

    def linear(k, out_f, in_f):
        kw, kb = jax.random.split(k)
        bound = 1.0 / math.sqrt(in_f)
        w = jax.random.uniform(kw, (out_f, in_f), jnp.float32, -bound, bound)
        b = jax.random.uniform(kb, (out_f,), jnp.float32, -bound, bound)
        return w, b

    w_enc, b_enc = linear(ks[0], D_MODEL, D_MODEL)                  # enccoder
    # MultiheadAttention packed in-projection (3*d, d), zero bias like PyTorch init
    bound_in = math.sqrt(6.0 / (3 * D_MODEL + D_MODEL))
    w_in = jax.random.uniform(ks[1], (3 * D_MODEL, D_MODEL), jnp.float32,
                              -bound_in, bound_in)
    b_in = jnp.zeros((3 * D_MODEL,), jnp.float32)
    w_out, b_out = linear(ks[2], D_MODEL, D_MODEL)                  # attn out_proj
    w1, b1 = linear(ks[3], DIM_FF, D_MODEL)                         # linear1
    w2, b2 = linear(ks[4], D_MODEL, DIM_FF)                         # linear2
    ln1_w = jnp.ones((D_MODEL,), jnp.float32)
    ln1_b = jnp.zeros((D_MODEL,), jnp.float32)
    ln2_w = jnp.ones((D_MODEL,), jnp.float32)
    ln2_b = jnp.zeros((D_MODEL,), jnp.float32)
    return dict(w_enc=w_enc, b_enc=b_enc, w_in=w_in, b_in=b_in,
                w_out=w_out, b_out=b_out, ln1_w=ln1_w, ln1_b=ln1_b,
                w1=w1, b1=b1, w2=w2, b2=b2, ln2_w=ln2_w, ln2_b=ln2_b)


def reference_forward(x, p):
    """Pure-JAX replica of the PyTorch forward (eval mode) for validation."""
    B, S, _ = x.shape
    enc = x @ p["w_enc"].T + p["b_enc"]
    qkv = enc @ p["w_in"].T + p["b_in"]
    q, k, v = jnp.split(qkv, 3, axis=-1)

    def heads(t):
        return t.reshape(B, S, N_HEAD, HEAD_DIM).transpose(0, 2, 1, 3)

    qh, kh, vh = heads(q), heads(k), heads(v)
    scores = jnp.einsum("bhqd,bhkd->bhqk", qh, kh) / math.sqrt(HEAD_DIM)
    p_attn = jax.nn.softmax(scores, axis=-1)
    o = jnp.einsum("bhqk,bhkd->bhqd", p_attn, vh)
    o = o.transpose(0, 2, 1, 3).reshape(B, S, D_MODEL)
    attn = o @ p["w_out"].T + p["b_out"]

    def ln(t, w, b):
        m = t.mean(-1, keepdims=True)
        var = ((t - m) ** 2).mean(-1, keepdims=True)
        return (t - m) / jnp.sqrt(var + LN_EPS) * w + b

    y = ln(enc + attn, p["ln1_w"], p["ln1_b"])
    h1 = jax.nn.relu(y @ p["w1"].T + p["b1"])
    ff = h1 @ p["w2"].T + p["b2"]
    return ln(y + ff, p["ln2_w"], p["ln2_b"])


if __name__ == "__main__":
    key = jax.random.PRNGKey(0)
    k_x, k_p = jax.random.split(key)

    B, S = 2, 8
    x = jax.random.normal(k_x, (B, S, D_MODEL), jnp.float32)
    params = init_params(k_p)

    out = jax.block_until_ready(trans_backbone_pallas(x, params))
    ref = jax.block_until_ready(reference_forward(x, params))

    # bf16 feed-forward + approx softmax reciprocal + default MXU precision
    # -> loose tolerance.
    if not np.allclose(np.asarray(out), np.asarray(ref), atol=2e-2, rtol=2e-2):
        raise AssertionError("Pallas kernel does not match reference forward")

    print("KERNEL_OK")
</pallas_src>

<mosaic_0001>
module attributes {stable_mosaic.version = 11 : i64} {
  func.func @kernel(%arg0: i32, %arg1: memref<16x32xf32, #tpu.memory_space<vmem>>, %arg2: memref<32x32xf32, #tpu.memory_space<vmem>>, %arg3: memref<1x32xf32, #tpu.memory_space<vmem>>, %arg4: memref<32x96xf32, #tpu.memory_space<vmem>>, %arg5: memref<1x96xf32, #tpu.memory_space<vmem>>, %arg6: memref<32x32xf32, #tpu.memory_space<vmem>>, %arg7: memref<1x32xf32, #tpu.memory_space<vmem>>, %arg8: memref<32x32xf32, #tpu.memory_space<vmem>>, %arg9: memref<32x32xf32, #tpu.memory_space<vmem>>, %arg10: memref<1x32xf32, #tpu.memory_space<vmem>>, %arg11: memref<1x32xf32, #tpu.memory_space<vmem>>, %arg12: memref<32x2048xbf16, #tpu.memory_space<vmem>>, %arg13: memref<1x2048xf32, #tpu.memory_space<vmem>>, %arg14: memref<2048x32xbf16, #tpu.memory_space<vmem>>, %arg15: memref<1x32xf32, #tpu.memory_space<vmem>>, %arg16: memref<1x32xf32, #tpu.memory_space<vmem>>, %arg17: memref<1x32xf32, #tpu.memory_space<vmem>>, %arg18: memref<16x32xf32, #tpu.memory_space<vmem>>) attributes {dimension_semantics = [#tpu.dimension_semantics<parallel>], iteration_bounds = array<i64: 1>, scalar_prefetch = 0 : i64, scratch_operands = 0 : i64, tpu.core_type = #tpu.core_type<tc>, window_params = [{transform_indices = @transform_0, window_bounds = array<i64: 16, 32>}, {pipeline_mode = #tpu.pipeline_mode<synchronous>, transform_indices = @transform_1, window_bounds = array<i64: 32, 32>}, {pipeline_mode = #tpu.pipeline_mode<synchronous>, transform_indices = @transform_2, window_bounds = array<i64: 1, 32>}, {pipeline_mode = #tpu.pipeline_mode<synchronous>, transform_indices = @transform_3, window_bounds = array<i64: 32, 96>}, {pipeline_mode = #tpu.pipeline_mode<synchronous>, transform_indices = @transform_4, window_bounds = array<i64: 1, 96>}, {pipeline_mode = #tpu.pipeline_mode<synchronous>, transform_indices = @transform_5, window_bounds = array<i64: 32, 32>}, {pipeline_mode = #tpu.pipeline_mode<synchronous>, transform_indices = @transform_6, window_bounds = array<i64: 1, 32>}, {pipeline_mode = #tpu.pipeline_mode<synchronous>, transform_indices = @transform_7, window_bounds = array<i64: 32, 32>}, {pipeline_mode = #tpu.pipeline_mode<synchronous>, transform_indices = @transform_8, window_bounds = array<i64: 32, 32>}, {pipeline_mode = #tpu.pipeline_mode<synchronous>, transform_indices = @transform_9, window_bounds = array<i64: 1, 32>}, {pipeline_mode = #tpu.pipeline_mode<synchronous>, transform_indices = @transform_10, window_bounds = array<i64: 1, 32>}, {pipeline_mode = #tpu.pipeline_mode<synchronous>, transform_indices = @transform_11, window_bounds = array<i64: 32, 2048>}, {pipeline_mode = #tpu.pipeline_mode<synchronous>, transform_indices = @transform_12, window_bounds = array<i64: 1, 2048>}, {pipeline_mode = #tpu.pipeline_mode<synchronous>, transform_indices = @transform_13, window_bounds = array<i64: 2048, 32>}, {pipeline_mode = #tpu.pipeline_mode<synchronous>, transform_indices = @transform_14, window_bounds = array<i64: 1, 32>}, {pipeline_mode = #tpu.pipeline_mode<synchronous>, transform_indices = @transform_15, window_bounds = array<i64: 1, 32>}, {pipeline_mode = #tpu.pipeline_mode<synchronous>, transform_indices = @transform_16, window_bounds = array<i64: 1, 32>}, {transform_indices = @transform_17, window_bounds = array<i64: 16, 32>}]} {
    %c0 = arith.constant 0 : index
    %c0_0 = arith.constant 0 : index
    %0 = vector.load %arg1[%c0, %c0_0] : memref<16x32xf32, #tpu.memory_space<vmem>>, vector<16x32xf32>
    %c0_1 = arith.constant 0 : index
    %c0_2 = arith.constant 0 : index
    %1 = vector.load %arg2[%c0_1, %c0_2] : memref<32x32xf32, #tpu.memory_space<vmem>>, vector<32x32xf32>
    %cst = arith.constant dense<0.000000e+00> : vector<16x32xf32>
    %2 = tpu.matmul %0, %1, %cst {dimension_numbers = #tpu.dot_dimension_numbers<[1], [0], [0], [1], [0, 0, 1, 1], [], []>} : vector<16x32xf32>, vector<32x32xf32>, vector<16x32xf32> -> vector<16x32xf32>
    %c0_3 = arith.constant 0 : index
    %c0_4 = arith.constant 0 : index
    %3 = vector.load %arg3[%c0_3, %c0_4] : memref<1x32xf32, #tpu.memory_space<vmem>>, vector<1x32xf32>
    %4 = vector.broadcast %3 : vector<1x32xf32> to vector<16x32xf32>
    %5 = arith.addf %2, %4 : vector<16x32xf32>
    %c0_5 = arith.constant 0 : index
    %c0_6 = arith.constant 0 : index
    %6 = vector.load %arg4[%c0_5, %c0_6] : memref<32x96xf32, #tpu.memory_space<vmem>>, vector<32x96xf32>
    %cst_7 = arith.constant dense<0.000000e+00> : vector<16x96xf32>
    %7 = tpu.matmul %5, %6, %cst_7 {dimension_numbers = #tpu.dot_dimension_numbers<[1], [0], [0], [1], [0, 0, 1, 1], [], []>} : vector<16x32xf32>, vector<32x96xf32>, vector<16x96xf32> -> vector<16x96xf32>
    %c0_8 = arith.constant 0 : index
    %c0_9 = arith.constant 0 : index
    %8 = vector.load %arg5[%c0_8, %c0_9] : memref<1x96xf32, #tpu.memory_space<vmem>>, vector<1x96xf32>
    %9 = vector.broadcast %8 : vector<1x96xf32> to vector<16x96xf32>
    %10 = arith.addf %7, %9 : vector<16x96xf32>
    %11 = vector.extract_strided_slice %10 {offsets = [0, 0], sizes = [16, 32], strides = [1, 1]} : vector<16x96xf32> to vector<16x32xf32>
    %cst_10 = arith.constant 0.353553385 : f32
    %12 = vector.broadcast %cst_10 : f32 to vector<16x32xf32>
    %13 = arith.mulf %11, %12 : vector<16x32xf32>
    %14 = vector.extract_strided_slice %10 {offsets = [0, 32], sizes = [16, 32], strides = [1, 1]} : vector<16x96xf32> to vector<16x32xf32>
    %15 = vector.extract_strided_slice %10 {offsets = [0, 64], sizes = [16, 32], strides = [1, 1]} : vector<16x96xf32> to vector<16x32xf32>
    %16 = vector.shape_cast %13 : vector<16x32xf32> to vector<2x8x32xf32>
    %17 = vector.shape_cast %14 : vector<16x32xf32> to vector<2x8x32xf32>
    %18 = vector.shape_cast %15 : vector<16x32xf32> to vector<2x8x32xf32>
    %c0_11 = arith.constant 0 : index
    %c0_12 = arith.constant 0 : index
    %19 = vector.load %arg8[%c0_11, %c0_12] : memref<32x32xf32, #tpu.memory_space<vmem>>, vector<32x32xf32>
    %20 = tpu.concatenate %17, %17, %17, %17 in 1 : vector<2x8x32xf32>, vector<2x8x32xf32>, vector<2x8x32xf32>, vector<2x8x32xf32> -> vector<2x32x32xf32>
    %21 = vector.shape_cast %19 : vector<32x32xf32> to vector<1x32x32xf32>
    %22 = vector.broadcast %21 : vector<1x32x32xf32> to vector<2x32x32xf32>
    %23 = arith.mulf %20, %22 : vector<2x32x32xf32>
    %24 = tpu.concatenate %18, %18, %18, %18 in 1 : vector<2x8x32xf32>, vector<2x8x32xf32>, vector<2x8x32xf32>, vector<2x8x32xf32> -> vector<2x32x32xf32>
    %25 = vector.shape_cast %19 : vector<32x32xf32> to vector<1x32x32xf32>
    %26 = vector.broadcast %25 : vector<1x32x32xf32> to vector<2x32x32xf32>
    %27 = arith.mulf %24, %26 : vector<2x32x32xf32>
    "tpu.trace_start"() <{level = 10 : i32, message = "bqc,bjc->bqj"}> : () -> ()
    %cst_13 = arith.constant dense<0.000000e+00> : vector<2x8x32xf32>
    %28 = tpu.matmul %16, %23, %cst_13 {dimension_numbers = #tpu.dot_dimension_numbers<[2], [2], [1], [1], [0, 0, 0, 1, 1, 1], [0], [0]>} : vector<2x8x32xf32>, vector<2x32x32xf32>, vector<2x8x32xf32> -> vector<2x8x32xf32>
    "tpu.trace_stop"() : () -> ()
    %cst_14 = arith.constant dense<0xFF800000> : vector<2x8xf32>
    %29 = vector.multi_reduction <maximumf>, %28, %cst_14 [2] : vector<2x8x32xf32> to vector<2x8xf32>
    %30 = vector.shape_cast %29 : vector<2x8xf32> to vector<2x8x1xf32>
    %31 = vector.broadcast %30 : vector<2x8x1xf32> to vector<2x8x32xf32>
    %32 = arith.subf %28, %31 : vector<2x8x32xf32>
    %33 = math.exp %32 : vector<2x8x32xf32>
    %34 = vector.shape_cast %33 : vector<2x8x32xf32> to vector<16x32xf32>
    %c0_15 = arith.constant 0 : index
    %c0_16 = arith.constant 0 : index
    %35 = vector.load %arg9[%c0_15, %c0_16] : memref<32x32xf32, #tpu.memory_space<vmem>>, vector<32x32xf32>
    %cst_17 = arith.constant dense<0.000000e+00> : vector<16x32xf32>
    %36 = tpu.matmul %34, %35, %cst_17 {dimension_numbers = #tpu.dot_dimension_numbers<[1], [0], [0], [1], [0, 0, 1, 1], [], []>} : vector<16x32xf32>, vector<32x32xf32>, vector<16x32xf32> -> vector<16x32xf32>
    %cst_18 = arith.constant 1.000000e-30 : f32
    %37 = vector.broadcast %cst_18 : f32 to vector<16x32xf32>
    %38 = arith.maximumf %36, %37 : vector<16x32xf32>
    %39 = tpu.reciprocal %38 {approx = true} : vector<16x32xf32> -> vector<16x32xf32>
    %40 = arith.mulf %34, %39 : vector<16x32xf32>
    %41 = vector.shape_cast %40 : vector<16x32xf32> to vector<2x8x32xf32>
    "tpu.trace_start"() <{level = 10 : i32, message = "bqi,bij->bqj"}> : () -> ()
    %cst_19 = arith.constant dense<0.000000e+00> : vector<2x8x32xf32>
    %42 = tpu.matmul %41, %27, %cst_19 {dimension_numbers = #tpu.dot_dimension_numbers<[2], [1], [1], [2], [0, 0, 0, 1, 1, 2], [0], [0]>} : vector<2x8x32xf32>, vector<2x32x32xf32>, vector<2x8x32xf32> -> vector<2x8x32xf32>
    "tpu.trace_stop"() : () -> ()
    %43 = vector.shape_cast %42 : vector<2x8x32xf32> to vector<16x32xf32>
    %c0_20 = arith.constant 0 : index
    %c0_21 = arith.constant 0 : index
    %44 = vector.load %arg6[%c0_20, %c0_21] : memref<32x32xf32, #tpu.memory_space<vmem>>, vector<32x32xf32>
    %cst_22 = arith.constant dense<0.000000e+00> : vector<16x32xf32>
    %45 = tpu.matmul %43, %44, %cst_22 {dimension_numbers = #tpu.dot_dimension_numbers<[1], [0], [0], [1], [0, 0, 1, 1], [], []>} : vector<16x32xf32>, vector<32x32xf32>, vector<16x32xf32> -> vector<16x32xf32>
    %c0_23 = arith.constant 0 : index
    %c0_24 = arith.constant 0 : index
    %46 = vector.load %arg7[%c0_23, %c0_24] : memref<1x32xf32, #tpu.memory_space<vmem>>, vector<1x32xf32>
    %47 = vector.broadcast %46 : vector<1x32xf32> to vector<16x32xf32>
    %48 = arith.addf %45, %47 : vector<16x32xf32>
    %49 = arith.addf %5, %48 : vector<16x32xf32>
    %c0_25 = arith.constant 0 : index
    %c0_26 = arith.constant 0 : index
    %50 = vector.load %arg10[%c0_25, %c0_26] : memref<1x32xf32, #tpu.memory_space<vmem>>, vector<1x32xf32>
    %c0_27 = arith.constant 0 : index
    %c0_28 = arith.constant 0 : index
    %51 = vector.load %arg11[%c0_27, %c0_28] : memref<1x32xf32, #tpu.memory_space<vmem>>, vector<1x32xf32>
    %cst_29 = arith.constant dense<0.000000e+00> : vector<16xf32>
    %52 = vector.multi_reduction <add>, %49, %cst_29 [1] : vector<16x32xf32> to vector<16xf32>
    %53 = vector.shape_cast %52 : vector<16xf32> to vector<16x1xf32>
    %cst_30 = arith.constant 3.200000e+01 : f32
    %54 = vector.broadcast %cst_30 : f32 to vector<16x1xf32>
    %55 = arith.divf %53, %54 : vector<16x1xf32>
    %56 = vector.broadcast %55 : vector<16x1xf32> to vector<16x32xf32>
    %57 = arith.subf %49, %56 : vector<16x32xf32>
    %58 = arith.mulf %57, %57 : vector<16x32xf32>
    %cst_31 = arith.constant dense<0.000000e+00> : vector<16xf32>
    %59 = vector.multi_reduction <add>, %58, %cst_31 [1] : vector<16x32xf32> to vector<16xf32>
    %60 = vector.shape_cast %59 : vector<16xf32> to vector<16x1xf32>
    %cst_32 = arith.constant 3.200000e+01 : f32
    %61 = vector.broadcast %cst_32 : f32 to vector<16x1xf32>
    %62 = arith.divf %60, %61 : vector<16x1xf32>
    %63 = vector.broadcast %55 : vector<16x1xf32> to vector<16x32xf32>
    %64 = arith.subf %49, %63 : vector<16x32xf32>
    %cst_33 = arith.constant 9.99999974E-6 : f32
    %65 = vector.broadcast %cst_33 : f32 to vector<16x1xf32>
    %66 = arith.addf %62, %65 : vector<16x1xf32>
    %67 = math.rsqrt %66 : vector<16x1xf32>
    %68 = vector.broadcast %67 : vector<16x1xf32> to vector<16x32xf32>
    %69 = arith.mulf %64, %68 : vector<16x32xf32>
    %70 = vector.broadcast %50 : vector<1x32xf32> to vector<16x32xf32>
    %71 = arith.mulf %69, %70 : vector<16x32xf32>
    %72 = vector.broadcast %51 : vector<1x32xf32> to vector<16x32xf32>
    %73 = arith.addf %71, %72 : vector<16x32xf32>
    %74 = arith.truncf %73 : vector<16x32xf32> to vector<16x32xbf16>
    %c0_34 = arith.constant 0 : index
    %c0_35 = arith.constant 0 : index
    %75 = vector.load %arg12[%c0_34, %c0_35] : memref<32x2048xbf16, #tpu.memory_space<vmem>>, vector<32x2048xbf16>
    %cst_36 = arith.constant dense<0.000000e+00> : vector<16x2048xf32>
    %76 = tpu.matmul %74, %75, %cst_36 {dimension_numbers = #tpu.dot_dimension_numbers<[1], [0], [0], [1], [0, 0, 1, 1], [], []>} : vector<16x32xbf16>, vector<32x2048xbf16>, vector<16x2048xf32> -> vector<16x2048xf32>
    %c0_37 = arith.constant 0 : index
    %c0_38 = arith.constant 0 : index
    %77 = vector.load %arg13[%c0_37, %c0_38] : memref<1x2048xf32, #tpu.memory_space<vmem>>, vector<1x2048xf32>
    %78 = vector.broadcast %77 : vector<1x2048xf32> to vector<16x2048xf32>
    %79 = arith.addf %76, %78 : vector<16x2048xf32>
    %cst_39 = arith.constant 0.000000e+00 : f32
    %80 = vector.broadcast %cst_39 : f32 to vector<16x2048xf32>
    %81 = arith.maximumf %79, %80 : vector<16x2048xf32>
    %82 = arith.truncf %81 : vector<16x2048xf32> to vector<16x2048xbf16>
    %c0_40 = arith.constant 0 : index
    %c0_41 = arith.constant 0 : index
    %83 = vector.load %arg14[%c0_40, %c0_41] : memref<2048x32xbf16, #tpu.memory_space<vmem>>, vector<2048x32xbf16>
    %cst_42 = arith.constant dense<0.000000e+00> : vector<16x32xf32>
    %84 = tpu.matmul %82, %83, %cst_42 {dimension_numbers = #tpu.dot_dimension_numbers<[1], [0], [0], [1], [0, 0, 1, 1], [], []>} : vector<16x2048xbf16>, vector<2048x32xbf16>, vector<16x32xf32> -> vector<16x32xf32>
    %c0_43 = arith.constant 0 : index
    %c0_44 = arith.constant 0 : index
    %85 = vector.load %arg15[%c0_43, %c0_44] : memref<1x32xf32, #tpu.memory_space<vmem>>, vector<1x32xf32>
    %86 = vector.broadcast %85 : vector<1x32xf32> to vector<16x32xf32>
    %87 = arith.addf %84, %86 : vector<16x32xf32>
    %88 = arith.addf %73, %87 : vector<16x32xf32>
    %c0_45 = arith.constant 0 : index
    %c0_46 = arith.constant 0 : index
    %89 = vector.load %arg16[%c0_45, %c0_46] : memref<1x32xf32, #tpu.memory_space<vmem>>, vector<1x32xf32>
    %c0_47 = arith.constant 0 : index
    %c0_48 = arith.constant 0 : index
    %90 = vector.load %arg17[%c0_47, %c0_48] : memref<1x32xf32, #tpu.memory_space<vmem>>, vector<1x32xf32>
    %cst_49 = arith.constant dense<0.000000e+00> : vector<16xf32>
    %91 = vector.multi_reduction <add>, %88, %cst_49 [1] : vector<16x32xf32> to vector<16xf32>
    %92 = vector.shape_cast %91 : vector<16xf32> to vector<16x1xf32>
    %cst_50 = arith.constant 3.200000e+01 : f32
    %93 = vector.broadcast %cst_50 : f32 to vector<16x1xf32>
    %94 = arith.divf %92, %93 : vector<16x1xf32>
    %95 = vector.broadcast %94 : vector<16x1xf32> to vector<16x32xf32>
    %96 = arith.subf %88, %95 : vector<16x32xf32>
    %97 = arith.mulf %96, %96 : vector<16x32xf32>
    %cst_51 = arith.constant dense<0.000000e+00> : vector<16xf32>
    %98 = vector.multi_reduction <add>, %97, %cst_51 [1] : vector<16x32xf32> to vector<16xf32>
    %99 = vector.shape_cast %98 : vector<16xf32> to vector<16x1xf32>
    %cst_52 = arith.constant 3.200000e+01 : f32
    %100 = vector.broadcast %cst_52 : f32 to vector<16x1xf32>
    %101 = arith.divf %99, %100 : vector<16x1xf32>
    %102 = vector.broadcast %94 : vector<16x1xf32> to vector<16x32xf32>
    %103 = arith.subf %88, %102 : vector<16x32xf32>
    %cst_53 = arith.constant 9.99999974E-6 : f32
    %104 = vector.broadcast %cst_53 : f32 to vector<16x1xf32>
    %105 = arith.addf %101, %104 : vector<16x1xf32>
    %106 = math.rsqrt %105 : vector<16x1xf32>
    %107 = vector.broadcast %106 : vector<16x1xf32> to vector<16x32xf32>
    %108 = arith.mulf %103, %107 : vector<16x32xf32>
    %109 = vector.broadcast %89 : vector<1x32xf32> to vector<16x32xf32>
    %110 = arith.mulf %108, %109 : vector<16x32xf32>
    %111 = vector.broadcast %90 : vector<1x32xf32> to vector<16x32xf32>
    %112 = arith.addf %110, %111 : vector<16x32xf32>
    %c0_54 = arith.constant 0 : index
    %c0_55 = arith.constant 0 : index
    %113 = vector.load %arg18[%c0_54, %c0_55] : memref<16x32xf32, #tpu.memory_space<vmem>>, vector<16x32xf32>
    tpu.vector_store %arg18[%c0_54, %c0_55], %112 {strides = array<i32>} : memref<16x32xf32, #tpu.memory_space<vmem>>, vector<16x32xf32>,
    return
  }
  func.func @transform_0(%arg0: i32) -> (i32, i32) {
    %c0_i32 = arith.constant 0 : i32
    %c0_i32_0 = arith.constant 0 : i32
    return %arg0, %c0_i32 : i32, i32
  }
  func.func @transform_1(%arg0: i32) -> (i32, i32) {
    %c0_i32 = arith.constant 0 : i32
    %c0_i32_0 = arith.constant 0 : i32
    %c0_i32_1 = arith.constant 0 : i32
    return %c0_i32, %c0_i32_0 : i32, i32
  }
  func.func @transform_2(%arg0: i32) -> (i32, i32) {
    %c0_i32 = arith.constant 0 : i32
    %c0_i32_0 = arith.constant 0 : i32
    %c0_i32_1 = arith.constant 0 : i32
    return %c0_i32, %c0_i32_0 : i32, i32
  }
  func.func @transform_3(%arg0: i32) -> (i32, i32) {
    %c0_i32 = arith.constant 0 : i32
    %c0_i32_0 = arith.constant 0 : i32
    %c0_i32_1 = arith.constant 0 : i32
    return %c0_i32, %c0_i32_0 : i32, i32
  }
  func.func @transform_4(%arg0: i32) -> (i32, i32) {
    %c0_i32 = arith.constant 0 : i32
    %c0_i32_0 = arith.constant 0 : i32
    %c0_i32_1 = arith.constant 0 : i32
    return %c0_i32, %c0_i32_0 : i32, i32
  }
  func.func @transform_5(%arg0: i32) -> (i32, i32) {
    %c0_i32 = arith.constant 0 : i32
    %c0_i32_0 = arith.constant 0 : i32
    %c0_i32_1 = arith.constant 0 : i32
    return %c0_i32, %c0_i32_0 : i32, i32
  }
  func.func @transform_6(%arg0: i32) -> (i32, i32) {
    %c0_i32 = arith.constant 0 : i32
    %c0_i32_0 = arith.constant 0 : i32
    %c0_i32_1 = arith.constant 0 : i32
    return %c0_i32, %c0_i32_0 : i32, i32
  }
  func.func @transform_7(%arg0: i32) -> (i32, i32) {
    %c0_i32 = arith.constant 0 : i32
    %c0_i32_0 = arith.constant 0 : i32
    %c0_i32_1 = arith.constant 0 : i32
    return %c0_i32, %c0_i32_0 : i32, i32
  }
  func.func @transform_8(%arg0: i32) -> (i32, i32) {
    %c0_i32 = arith.constant 0 : i32
    %c0_i32_0 = arith.constant 0 : i32
    %c0_i32_1 = arith.constant 0 : i32
    return %c0_i32, %c0_i32_0 : i32, i32
  }
  func.func @transform_9(%arg0: i32) -> (i32, i32) {
    %c0_i32 = arith.constant 0 : i32
    %c0_i32_0 = arith.constant 0 : i32
    %c0_i32_1 = arith.constant 0 : i32
    return %c0_i32, %c0_i32_0 : i32, i32
  }
  func.func @transform_10(%arg0: i32) -> (i32, i32) {
    %c0_i32 = arith.constant 0 : i32
    %c0_i32_0 = arith.constant 0 : i32
    %c0_i32_1 = arith.constant 0 : i32
    return %c0_i32, %c0_i32_0 : i32, i32
  }
  func.func @transform_11(%arg0: i32) -> (i32, i32) {
    %c0_i32 = arith.constant 0 : i32
    %c0_i32_0 = arith.constant 0 : i32
    %c0_i32_1 = arith.constant 0 : i32
    return %c0_i32, %c0_i32_0 : i32, i32
  }
  func.func @transform_12(%arg0: i32) -> (i32, i32) {
    %c0_i32 = arith.constant 0 : i32
    %c0_i32_0 = arith.constant 0 : i32
    %c0_i32_1 = arith.constant 0 : i32
    return %c0_i32, %c0_i32_0 : i32, i32
  }
  func.func @transform_13(%arg0: i32) -> (i32, i32) {
    %c0_i32 = arith.constant 0 : i32
    %c0_i32_0 = arith.constant 0 : i32
    %c0_i32_1 = arith.constant 0 : i32
    return %c0_i32, %c0_i32_0 : i32, i32
  }
  func.func @transform_14(%arg0: i32) -> (i32, i32) {
    %c0_i32 = arith.constant 0 : i32
    %c0_i32_0 = arith.constant 0 : i32
    %c0_i32_1 = arith.constant 0 : i32
    return %c0_i32, %c0_i32_0 : i32, i32
  }
  func.func @transform_15(%arg0: i32) -> (i32, i32) {
    %c0_i32 = arith.constant 0 : i32
    %c0_i32_0 = arith.constant 0 : i32
    %c0_i32_1 = arith.constant 0 : i32
    return %c0_i32, %c0_i32_0 : i32, i32
  }
  func.func @transform_16(%arg0: i32) -> (i32, i32) {
    %c0_i32 = arith.constant 0 : i32
    %c0_i32_0 = arith.constant 0 : i32
    %c0_i32_1 = arith.constant 0 : i32
    return %c0_i32, %c0_i32_0 : i32, i32
  }
  func.func @transform_17(%arg0: i32) -> (i32, i32) {
    %c0_i32 = arith.constant 0 : i32
    %c0_i32_0 = arith.constant 0 : i32
    return %arg0, %c0_i32 : i32, i32
  }
}

</mosaic_0001>

<bundles_post_ra>
// kernel: tpu_custom_call.1
= control target key start
LH: loop header
LB: loop body
LE: loop exit
PB: predicated region body
PF: predicated region fallthrough
CT: control target
= control target key end

     0   :  { %s4187_s0 = inlined_call_operand.vmem [shape: f32[16,32], index: 0, kind: input, shape index: {}]   ;;  %s4188_s1 = inlined_call_operand.vmem [shape: f32[32,32], index: 1, kind: input, shape index: {}]   ;;  %s4189_s2 = inlined_call_operand.vmem [shape: f32[1,32], index: 2, kind: input, shape index: {}]   ;;  %s4190_s3 = inlined_call_operand.vmem [shape: f32[32,96], index: 3, kind: input, shape index: {}]   ;;  %s4191_s4 = inlined_call_operand.vmem [shape: f32[1,96], index: 4, kind: input, shape index: {}]   ;;  %s4192_s5 = inlined_call_operand.vmem [shape: f32[32,32], index: 5, kind: input, shape index: {}]   ;;  %s4193_s6 = inlined_call_operand.vmem [shape: f32[1,32], index: 6, kind: input, shape index: {}]   ;;  %s4194_s7 = inlined_call_operand.vmem [shape: f32[32,32], index: 7, kind: input, shape index: {}]   ;;  %s4195_s8 = inlined_call_operand.vmem [shape: f32[32,32], index: 8, kind: input, shape index: {}]   ;;  %s4196_s9 = inlined_call_operand.vmem [shape: f32[1,32], index: 9, kind: input, shape index: {}]   ;;  %s4197_s10 = inlined_call_operand.vmem [shape: f32[1,32], index: 10, kind: input, shape index: {}]   ;;  %s4198_s11 = inlined_call_operand.vmem [shape: bf16[32,2048], index: 11, kind: input, shape index: {}]   ;;  %s4199_s12 = inlined_call_operand.vmem [shape: f32[1,2048], index: 12, kind: input, shape index: {}]   ;;  %s4200_s13 = inlined_call_operand.vmem [shape: bf16[2048,32], index: 13, kind: input, shape index: {}]   ;;  %s4201_s14 = inlined_call_operand.vmem [shape: f32[1,32], index: 14, kind: input, shape index: {}]   ;;  %s4202_s15 = inlined_call_operand.vmem [shape: f32[1,32], index: 15, kind: input, shape index: {}]   ;;  %s4203_s16 = inlined_call_operand.vmem [shape: f32[1,32], index: 16, kind: input, shape index: {}]   ;;  %s4204_s17 = inlined_call_operand.hbm [shape: f32[16,32], index: 17, kind: output, shape index: {}]  }
   0x1   :  { %4207 = sst [smem:[#allocation5_spill]] %s4187_s0 }
   0x2   :  { %4208 = sst [smem:[#allocation6_spill]] %s4188_s1 }
   0x3   :  { %s4209_s26 = sld [smem:[#allocation6_spill]]  ;;  %v101_v4 = vld [vmem:[%s4190_s3 + $0x18] sm:$0xff]  ;;  %v100_v5 = vld [vmem:[%s4190_s3 + $0x10] sm:$0xff]  ;;  %vm68_vm0 = vcmask 261120  }
   0x4   :  { %s4210_s24 = sld [smem:[#allocation5_spill]]  ;;  %124 = vmatpush.msra.mxu1 %v101_v4 }
   0x6   :  { %125 = vmatpush.msra.mxu1 %v100_v5 }
   0x9   :  { %v63_v0 = vld [vmem:[%s4209_s26 + $0x18] sm:$0xff]  ;;  %v62_v1 = vld [vmem:[%s4209_s26 + $0x10] sm:$0xff]  ;;  %v61_v2 = vld [vmem:[%s4209_s26 + $0x8] sm:$0xff] }
   0xa   :  { %87 = vmatpush.msra.mxu0 %v63_v0  ;;  %v60_v3 = vld [vmem:[%s4209_s26] sm:$0xff] }
   0xb   :  { %v58_v6 = vld [vmem:[%s4210_s24] sm:$0xff] }
   0xc   :  { %88 = vmatpush.msra.mxu0 %v62_v1 }
   0xe   :  { %89 = vmatpush.msra.mxu0 %v61_v2 }
   0xf   :  { %22 = vsyncpa [#allocation3], 0  ;;  %v59_v7 = vld [vmem:[%s4210_s24 + $0x8] sm:$0xff]  ;;  %v98_v9 = vld [vmem:[%s4190_s3] sm:$0xff]  ;;  %s3251_s20 = smov 32   ;;  %s2324_s28 = sshll.u32 %s4204_s17, 4  ;;  %s2325_s28 = int_to_ptr.hbm [resolvable:$true] %s2324_s28 }
  0x10   :  { %90 = vmatpush.msra.mxu0 %v60_v3  ;;  %v99_v8 = vld [vmem:[%s4190_s3 + $0x8] sm:$0xff]  ;;  %v140_v10 = vld [vmem:[%s4194_s7 + $0x18] sm:$0xff]  ;;  %v139_v12 = vld [vmem:[%s4194_s7 + $0x10] sm:$0xff]  ;;  %s3257_s29 = smov 8  }
  0x11   :  { %2336 = vmatmul.msk.f32.vlgmr.msra.gmra.mxu0 %vm68_vm0, %v58_v6  ;;  %126 = vmatpush.msra.mxu1 %v99_v8  ;;  %v138_v11 = vld [vmem:[%s4194_s7 + $0x8] sm:$0xff]  ;;  %v137_v13 = vld [vmem:[%s4194_s7] sm:$0xff]  ;;  %v286_v8 = vld [vmem:[%s4195_s8 + $0x18] sm:$0xff] }
  0x12   :  { %151 = vrot.lane.b32.xlu0 %v140_v10, %s3251_s20  ;;  %147 = vrot.lane.b32.xlu1 %v138_v11, %s3251_s20  ;;  %v3199_v14 = vld [vmem:[%s4189_s2] ss:$0 sm:$0xff]  ;;  %s3252_s2 = smov 96  }
  0x13   :  { %127 = vmatpush.msra.mxu1 %v98_v9  ;;  %v3200_v19 = vld [vmem:[%s4191_s4] ss:$0 sm:$0xff]  ;;  %s3253_s4 = smov 64   ;;  %v285_v9 = vld [vmem:[%s4195_s8 + $0x10] sm:$0xff]  ;;  %305 = vmatpush.msrb.mxu0 %v286_v8  ;;  %v3028_v8 = vld [vmem:[%s4198_s11 + $0x84] sm:$0xf] }
  0x15   :  { %306 = vmatpush.msrb.mxu0 %v285_v9 }
  0x19   :  { %2337 = vmatmul.msk.f32.gmra.mxu0 %vm68_vm0, %v59_v7 }
  0x1a   :  { %149 = vrot.lane.b32.xlu0 %v139_v12, %s3251_s20  ;;  %145 = vrot.lane.b32.xlu1 %v137_v13, %s3251_s20 }
  0x84   :  { %v152_v20 = vpop.permute.xlu0 %151  ;;  %v148_v23 = vpop.permute.xlu1 %147 }
  0x8c   :  { %v150_v26 = vpop.permute.xlu0 %149  ;;  %v146_v32 = vpop.permute.xlu1 %145 }
  0x8e   :  { %v92_v15 = vpop.f32.mrf.mxu0 }
  0x8f   :  { %v3395_v16 = vadd.f32 %v3199_v14, %v92_v15 }
  0x91   :  { %2338 = vmatmul.msk.f32.vlgmr.msra.gmra.mxu1 %vm68_vm0, %v3395_v16 }
  0x96   :  { %v95_v17 = vpop.f32.mrf.mxu0 }
  0x97   :  { %v3399_v18 = vadd.f32 %v3199_v14, %v95_v17 }
  0x99   :  { %2339 = vmatmul.msk.f32.gmra.mxu1 %vm68_vm0, %v3399_v18 }
 0x10e   :  { %v129_v21 = vpop.f32.mrf.mxu1 }
 0x10f   :  { %v3406_v22 = vadd.f32 %v3200_v19, %v129_v21 }
 0x111   :  { %v160_v24 = vmul.f32 %v152_v20, %v3406_v22  ;;  %v158_v25 = vmul.f32 %v148_v23, %v3406_v22  ;;  %v159_v29 = vmul.f32 %v150_v26, %v3406_v22  ;;  %v157_v33 = vmul.f32 %v146_v32, %v3406_v22 }
 0x112   :  { %v135_v41 = vmul.f32 0.35355338, %v3406_v22 }
 0x113   :  { %195 = vrot.lane.b32.xlu2 %v160_v24, %s3252_s2  ;;  %191 = vrot.lane.b32.xlu0 %v158_v25, %s3252_s2 }
 0x116   :  { %v132_v27 = vpop.f32.mrf.mxu1 }
 0x117   :  { %v3410_v28 = vadd.f32 %v3200_v19, %v132_v27 }
 0x119   :  { %v164_v30 = vmul.f32 %v152_v20, %v3410_v28  ;;  %v163_v31 = vmul.f32 %v150_v26, %v3410_v28  ;;  %v162_v34 = vmul.f32 %v148_v23, %v3410_v28  ;;  %v161_v35 = vmul.f32 %v146_v32, %v3410_v28 }
 0x11a   :  { %v136_v50 = vmul.f32 0.35355338, %v3410_v28 }
 0x11b   :  { %238 = vrot.lane.b32.xlu1 %v164_v30, %s3252_s2  ;;  %193 = vrot.lane.b32.xlu2 %v159_v29, %s3252_s2  ;;  %v402_v29 = vld [vmem:[%s4192_s5 + $0x10] sm:$0xff]  ;;  %v401_v30 = vld [vmem:[%s4192_s5 + $0x8] sm:$0xff] }
 0x11c   :  { %236 = vrot.lane.b32.xlu0 %v163_v31, %s3252_s2 }
 0x123   :  { %234 = vrot.lane.b32.xlu1 %v162_v34, %s3252_s2  ;;  %189 = vrot.lane.b32.xlu2 %v157_v33, %s3252_s2 }
 0x12b   :  { %232 = vrot.lane.b32.xlu2 %v161_v35, %s3252_s2 }
 0x133   :  { %171 = vrot.lane.b32.xlu2 %v140_v10, %s3253_s4  ;;  %v284_v10 = vld [vmem:[%s4195_s8 + $0x8] sm:$0xff] }
 0x134   :  { %307 = vmatpush.msrb.mxu0 %v284_v10 }
 0x13b   :  { %169 = vrot.lane.b32.xlu2 %v139_v12, %s3253_s4 }
 0x143   :  { %167 = vrot.lane.b32.xlu2 %v138_v11, %s3253_s4  ;;  %v283_v11 = vld [vmem:[%s4195_s8] sm:$0xff] }
 0x144   :  { %308 = vmatpush.msrb.mxu0 %v283_v11  ;;  %v2424_v11 = vld [vmem:[%s4198_s11 + $0xc0] sm:$0xf0] }
 0x14b   :  { %165 = vrot.lane.b32.xlu2 %v137_v13, %s3253_s4 }
 0x16d   :  { %v196_v36 = vpop.permute.xlu2 %195 }
 0x16e   :  { %2340 = vmatpush.xpose.msk.msra.mxu2 %vm68_vm0, %v196_v36 }
 0x175   :  { %v194_v37 = vpop.permute.xlu2 %193 }
 0x176   :  { %2341 = vmatpush.xpose.msk.msra.mxu2 %vm68_vm0, %v194_v37 }
 0x17d   :  { %v190_v38 = vpop.permute.xlu2 %189 }
 0x185   :  { %v192_v39 = vpop.permute.xlu0 %191  ;;  %v233_v40 = vpop.permute.xlu2 %232 }
 0x186   :  { %2342 = vmatpush.xpose.msk.msra.mxu2 %vm68_vm0, %v192_v39  ;;  %v400_v39 = vld [vmem:[%s4192_s5] sm:$0xff] }
 0x18a   :  { %2343 = vmatpush.xpose.msk.msra.mxu2 %vm68_vm0, %v190_v38 }
 0x18d   :  { %v239_v42 = vpop.permute.xlu1 %238  ;;  %v172_v43 = vpop.permute.xlu2 %171  ;;  %2344 = vmatmul.msk.f32.vlgmr.msra.gmra.mxu2 %vm68_vm0, %v135_v41 }
 0x18e   :  { %2345 = vmatpush.xpose.msk.msra.mxu3 %vm68_vm0, %v239_v42  ;;  %v237_v44 = vpop.permute.xlu0 %236  ;;  %v180_v47 = vmul.f32 %v172_v43, %v3406_v22  ;;  %v184_v52 = vmul.f32 %v172_v43, %v3410_v28  ;;  %v3201_v42 = vld [vmem:[%s4193_s6] ss:$0 sm:$0xff] }
 0x192   :  { %2346 = vmatpush.xpose.msk.msra.mxu3 %vm68_vm0, %v237_v44 }
 0x195   :  { %v235_v45 = vpop.permute.xlu1 %234  ;;  %v170_v46 = vpop.permute.xlu2 %169 }
 0x196   :  { %v179_v48 = vmul.f32 %v170_v46, %v3406_v22  ;;  %2347 = vmatpush.xpose.msk.msra.mxu3 %vm68_vm0, %v235_v45  ;;  %v183_v3 = vmul.f32 %v170_v46, %v3410_v28 }
 0x198   :  { %v3179_v49 = vpack.i.bf16 %v179_v48, %v180_v47 }
 0x19a   :  { %2348 = vmatpush.xpose.msk.msra.mxu3 %vm68_vm0, %v233_v40  ;;  %3180 = vrot.lane.b32.xlu2 %v3179_v49, %s3253_s4 }
 0x19d   :  { %2349 = vmatmul.msk.f32.vlgmr.msra.gmra.mxu3 %vm68_vm0, %v136_v50  ;;  %v168_v51 = vpop.permute.xlu2 %167 }
 0x19e   :  { %v178_v53 = vmul.f32 %v168_v51, %v3406_v22  ;;  %v182_v6 = vmul.f32 %v168_v51, %v3410_v28  ;;  %v3254_v51 = vmov 32.0  }
 0x1a0   :  { %v3184_v54 = vpack.i.bf16 %v178_v53, %v184_v52 }
 0x1a2   :  { %3185 = vrot.lane.b32.xlu2 %v3184_v54, %s3253_s4 }
 0x1a5   :  { %v166_v55 = vpop.permute.xlu2 %165 }
 0x1a6   :  { %v177_v0 = vmul.f32 %v166_v55, %v3406_v22  ;;  %v181_v5 = vmul.f32 %v166_v55, %v3410_v28  ;;  %v403_v28 = vld [vmem:[%s4192_s5 + $0x18] sm:$0xff] }
 0x1a7   :  { %426 = vmatpush.msrb.mxu3 %v403_v28 }
 0x1a8   :  { %v3189_v4 = vpack.i.bf16 %v177_v0, %v183_v3  ;;  %v3194_v7 = vpack.i.bf16 %v181_v5, %v182_v6  ;;  %v2422_v6 = vld [vmem:[%s4198_s11 + $0x80] sm:$0xf] }
 0x1a9   :  { %427 = vmatpush.msrb.mxu3 %v402_v29  ;;  %v3021_v29 = vld [vmem:[%s4198_s11 + $0x44] sm:$0xf0] }
 0x1ab   :  { %428 = vmatpush.msrb.mxu3 %v401_v30  ;;  %v3013_v30 = vld [vmem:[%s4198_s11 + $0xc] sm:$0xf] }
 0x1ad   :  { %429 = vmatpush.msrb.mxu3 %v400_v39 }
 0x1f4   :  { %v3181_v56 = vpop.permute.xlu2 %3180 }
 0x1f5   :  { %v3182_v57 = vunpack.i.l.bf16 %v3181_v56  ;;  %v3183_v58 = vunpack.i.h.bf16 %v3181_v56 }
 0x1f7   :  { %353 = vmatpush.msrb.mxu1 %v3182_v57 }
 0x1f9   :  { %354 = vmatpush.msrb.mxu1 %v3183_v58 }
 0x1fc   :  { %v3186_v59 = vpop.permute.xlu2 %3185 }
 0x1fd   :  { %v3188_v60 = vunpack.i.h.bf16 %v3186_v59  ;;  %v3187_v61 = vunpack.i.l.bf16 %v3186_v59 }
 0x1ff   :  { %355 = vmatpush.msrb.mxu1 %v3188_v60  ;;  %392 = vmatpush.msrb.mxu2 %v3187_v61 }
 0x210   :  { %v225_v62 = vpop.f32.mrf.mxu2 }
 0x211   :  { %v271_v63 = vsel %vm68_vm0, %v225_v62, -inf }
 0x212   :  { %272 = vmax.xlane.f32.xlu0 %v271_v63 }
 0x220   :  { %v268_v1 = vpop.f32.mrf.mxu3 }
 0x221   :  { %v274_v2 = vsel %vm68_vm0, %v268_v1, -inf }
 0x222   :  { %275 = vmax.xlane.f32.xlu1 %v274_v2 }
 0x226   :  { %3190 = vrot.lane.b32.xlu0 %v3189_v4, %s3253_s4 }
 0x23b   :  { %3195 = vrot.lane.b32.xlu1 %v3194_v7, %s3253_s4  ;;  %v3036_v7 = vld [vmem:[%s4198_s11 + $0xbc] sm:$0xf0] }
 0x23c   :  { %v2423_v10 = vor.u32 %v3036_v7, %v2422_v6 }
 0x285   :  { %v273_v12 = vpop.xlane.xlu0 %272 }
 0x286   :  { %v277_v13 = vsub.f32 %v225_v62, %v273_v12  ;;  %v2430_v12 = vld [vmem:[%s4198_s11 + $0x88] sm:$0xf] }
 0x288   :  { %v279_v14 = vmul.f32 1.442695, %v277_v13  ;;  %v2427_v13 = vor.u32 %v3028_v8, %v2424_v11 }
 0x28a   :  { %3207 = vpow2.f32 %v279_v14  ;;  %v3037_v14 = vld [vmem:[%s4198_s11 + $0xc4] sm:$0xf0] }
 0x290   :  { %v3208_v15 = vpop.eup %3207 }
 0x291   :  { %2350 = vmatmul.msk.f32.vlgmr.msrb.gmra.mxu0 %vm68_vm0, %v3208_v15 }
 0x295   :  { %v276_v17 = vpop.xlane.xlu1 %275 }
 0x296   :  { %v278_v19 = vsub.f32 %v268_v1, %v276_v17  ;;  %v2432_v17 = vld [vmem:[%s4198_s11 + $0xc8] sm:$0xf0] }
 0x298   :  { %v281_v20 = vmul.f32 1.442695, %v278_v19  ;;  %v3191_v21 = vpop.permute.xlu0 %3190  ;;  %v2431_v19 = vor.u32 %v3037_v14, %v2430_v12 }
 0x299   :  { %v3193_v22 = vunpack.i.h.bf16 %v3191_v21  ;;  %v3192_v23 = vunpack.i.l.bf16 %v3191_v21  ;;  %v2358_v21 = vld [vmem:[%s4198_s11] sm:$0xf] }
 0x29a   :  { %3209 = vpow2.f32 %v281_v20  ;;  %768 = vmatpush.bf16.msra.mxu0 %v2431_v19  ;;  %v2456_v19 = vld [vmem:[%s4198_s11 + $0xe0] sm:$0xf0] }
 0x29b   :  { %356 = vmatpush.msrb.mxu1 %v3193_v22  ;;  %393 = vmatpush.msrb.mxu2 %v3192_v23  ;;  %v3020_v22 = vld [vmem:[%s4198_s11 + $0x3c] sm:$0xf0] }
 0x29d   :  { %740 = vmatpush.bf16.msra.mxu1 %v2423_v10 }
 0x2a0   :  { %v3210_v24 = vpop.eup %3209 }
 0x2a1   :  { %2351 = vmatmul.msk.f32.gmra.mxu0 %vm68_vm0, %v3210_v24 }
 0x2ad   :  { %v3196_v25 = vpop.permute.xlu1 %3195 }
 0x2ae   :  { %v3197_v26 = vunpack.i.l.bf16 %v3196_v25  ;;  %v3198_v27 = vunpack.i.h.bf16 %v3196_v25  ;;  %v3012_v25 = vld [vmem:[%s4198_s11 + $0x4] sm:$0xf] }
 0x2b0   :  { %394 = vmatpush.msrb.mxu2 %v3197_v26  ;;  %v2360_v26 = vld [vmem:[%s4198_s11 + $0x40] sm:$0xf0] }
 0x2b1   :  { %v2363_v28 = vor.u32 %v3012_v25, %v2360_v26 }
 0x2b2   :  { %395 = vmatpush.msrb.mxu2 %v3198_v27  ;;  %v2366_v27 = vld [vmem:[%s4198_s11 + $0x8] sm:$0xf] }
 0x2b4   :  { %754 = vmatpush.bf16.msra.mxu2 %v2427_v13 }
 0x2b8   :  { %755 = vmatpush.bf16.msra.mxu2 %v2363_v28  ;;  %v2390_v28 = vld [vmem:[%s4198_s11 + $0x20] sm:$0xf] }
 0x30e   :  { %v310_v31 = vpop.f32.mrf.mxu0 }
 0x30f   :  { %v316_v32 = vmax.f32 %v310_v31, 1e-30  ;;  %v2367_v31 = vor.u32 %v3021_v29, %v2366_v27  ;;  %v3024_v29 = vld [vmem:[%s4198_s11 + $0x5c] sm:$0xf0] }
 0x311   :  { %3211 = vrcp.f32 %v316_v32  ;;  %v2368_v32 = vld [vmem:[%s4198_s11 + $0x48] sm:$0xf0]  ;;  %769 = vmatpush.bf16.msra.mxu0 %v2367_v31 }
 0x317   :  { %v3212_v33 = vpop.eup %3211 }
 0x318   :  { %v320_v34 = vmul.f32 %v3212_v33, %v3208_v15  ;;  %v3029_v15 = vld [vmem:[%s4198_s11 + $0x8c] sm:$0xf]  ;;  %v2371_v33 = vor.u32 %v3013_v30, %v2368_v32  ;;  %v3016_v32 = vld [vmem:[%s4198_s11 + $0x24] sm:$0xf] }
 0x319   :  { %v2435_v20 = vor.u32 %v3029_v15, %v2432_v17  ;;  %v2454_v15 = vld [vmem:[%s4198_s11 + $0xa0] sm:$0xf]  ;;  %v3032_v17 = vld [vmem:[%s4198_s11 + $0xa4] sm:$0xf] }
 0x31a   :  { %2352 = vmatmul.msk.f32.vlgmr.msrb.gmra.mxu1 %vm68_vm0, %v320_v34  ;;  %v2459_v27 = vor.u32 %v3032_v17, %v2456_v19  ;;  %v3056_v17 = vld [vmem:[%s4200_s13 + $0x60] sm:$0xff] }
 0x31b   :  { %782 = vmatpush.bf16.msra.mxu3 %v2435_v20  ;;  %v3072_v19 = vld [vmem:[%s4200_s13 + $0xe0] sm:$0xff] }
 0x31e   :  { %v313_v35 = vpop.f32.mrf.mxu0 }
 0x31f   :  { %v317_v36 = vmax.f32 %v313_v35, 1e-30  ;;  %783 = vmatpush.bf16.msra.mxu3 %v2371_v33  ;;  %v2392_v33 = vld [vmem:[%s4198_s11 + $0x60] sm:$0xf0] }
 0x321   :  { %3213 = vrcp.f32 %v317_v36  ;;  %v2438_v36 = vld [vmem:[%s4198_s11 + $0x90] sm:$0xf] }
 0x322   :  { %3215 = vrcp.f32 %v3254_v51  ;;  %v3022_v51 = vld [vmem:[%s4198_s11 + $0x4c] sm:$0xf0] }
 0x327   :  { %v3214_v37 = vpop.eup %3213 }
 0x328   :  { %v321_v38 = vmul.f32 %v3214_v37, %v3210_v24  ;;  %v3216_v52 = vpop.eup %3215  ;;  %v2359_v24 = vor.u32 %v3020_v22, %v2358_v21  ;;  %v3038_v37 = vld [vmem:[%s4198_s11 + $0xcc] sm:$0xf0]  ;;  %v3041_v22 = vld [vmem:[%s4198_s11 + $0xe4] sm:$0xf0] }
 0x329   :  { %v448_v53 = vmul.f32 32.0, %v3216_v52  ;;  %vm452_vm1 = vweird.f32 %v3216_v52 }
 0x32a   :  { %2353 = vmatmul.msk.f32.vlgmr.msrb.gmra.mxu2 %vm68_vm0, %v321_v38  ;;  %741 = vmatpush.bf16.msra.mxu1 %v2359_v24  ;;  %v3030_v38 = vld [vmem:[%s4198_s11 + $0x94] sm:$0xf]  ;;  %v2464_v24 = vld [vmem:[%s4198_s11 + $0xe8] sm:$0xf0] }
 0x32b   :  { %v449_v54 = vsub.f32 1.0, %v448_v53 }
 0x32d   :  { %v450_v55 = vmul.f32 %v3216_v52, %v449_v54  ;;  %v2376_v54 = vld [vmem:[%s4198_s11 + $0x50] sm:$0xf0] }
 0x32f   :  { %v451_v56 = vadd.f32 %v3216_v52, %v450_v55  ;;  %v2382_v55 = vld [vmem:[%s4198_s11 + $0x18] sm:$0xf] }
 0x331   :  { %v3485_v57 = vsel %vm452_vm1, %v3216_v52, %v451_v56  ;;  %v3014_v52 = vld [vmem:[%s4198_s11 + $0x14] sm:$0xf]  ;;  %v3023_v56 = vld [vmem:[%s4198_s11 + $0x54] sm:$0xf0] }
 0x397   :  { %v358_v40 = vpop.f32.mrf.mxu1 }
 0x398   :  { %2354 = vmatmul.msk.f32.vlgmr.msrb.gmra.mxu3 %vm68_vm0, %v358_v40  ;;  %v2439_v40 = vor.u32 %v3038_v37, %v2438_v36  ;;  %v3017_v36 = vld [vmem:[%s4198_s11 + $0x2c] sm:$0xf] }
 0x399   :  { %v2400_v37 = vld [vmem:[%s4198_s11 + $0x68] sm:$0xf0] }
 0x39a   :  { %796 = vmatpush.bf16.msrb.mxu1 %v2439_v40 }
 0x3ad   :  { %v397_v41 = vpop.f32.mrf.mxu2 }
 0x3ae   :  { %2355 = vmatmul.msk.f32.gmra.mxu3 %vm68_vm0, %v397_v41  ;;  %v2440_v41 = vld [vmem:[%s4198_s11 + $0xd0] sm:$0xf0] }
 0x41b   :  { %v431_v43 = vpop.f32.mrf.mxu3 }
 0x41c   :  { %v432_v44 = vadd.f32 %v3201_v42, %v431_v43  ;;  %v3039_v43 = vld [vmem:[%s4198_s11 + $0xd4] sm:$0xf0] }
 0x41e   :  { %v437_v45 = vadd.f32 %v432_v44, %v3395_v16  ;;  %v2443_v44 = vor.u32 %v3030_v38, %v2440_v41  ;;  %v2391_v38 = vor.u32 %v3024_v29, %v2390_v28  ;;  %v2403_v41 = vor.u32 %v3017_v36, %v2400_v37  ;;  %v3054_v28 = vld [vmem:[%s4200_s13 + $0x50] sm:$0xff]  ;;  %v3045_v29 = vld [vmem:[%s4200_s13 + $0x8] sm:$0xff]  ;;  %v3099_v36 = vld [vmem:[%s4200_s13 + $0x1b8] sm:$0xff] }
 0x41f   :  { %v3052_v37 = vld [vmem:[%s4200_s13 + $0x40] sm:$0xff] }
 0x420   :  { %v441_v46 = vsel %vm68_vm0, %v437_v45, 0.0  ;;  %810 = vmatpush.bf16.msrb.mxu2 %v2443_v44  ;;  %v3034_v44 = vld [vmem:[%s4198_s11 + $0xb4] sm:$0xf] }
 0x421   :  { %442 = vadd.xlane.f32.xlu2 %v441_v46  ;;  %v3031_v46 = vld [vmem:[%s4198_s11 + $0x9c] sm:$0xf] }
 0x431   :  { %v434_v47 = vpop.f32.mrf.mxu3 }
 0x432   :  { %v435_v48 = vadd.f32 %v3201_v42, %v434_v47  ;;  %v2446_v42 = vld [vmem:[%s4198_s11 + $0x98] sm:$0xf]  ;;  %v2448_v47 = vld [vmem:[%s4198_s11 + $0xd8] sm:$0xf0] }
 0x434   :  { %v438_v49 = vadd.f32 %v435_v48, %v3399_v18  ;;  %v2374_v48 = vld [vmem:[%s4198_s11 + $0x10] sm:$0xf] }
 0x435   :  { %v2375_v53 = vor.u32 %v3022_v51, %v2374_v48  ;;  %v3035_v48 = vld [vmem:[%s4198_s11 + $0xbc] sm:$0xf] }
 0x436   :  { %v444_v50 = vsel %vm68_vm0, %v438_v49, 0.0 }
 0x437   :  { %445 = vadd.xlane.f32.xlu0 %v444_v50  ;;  %v2451_v50 = vor.u32 %v3031_v46, %v2448_v47  ;;  %797 = vmatpush.bf16.msrb.mxu1 %v2375_v53  ;;  %v2478_v46 = vld [vmem:[%s4198_s11 + $0xb8] sm:$0xf]  ;;  %v3026_v53 = vld [vmem:[%s4198_s11 + $0x6c] sm:$0xf0] }
 0x438   :  { %v3043_v47 = vld [vmem:[%s4198_s11 + $0xf4] sm:$0xf0] }
 0x439   :  { %838 = vmatpush.bf16.msrb.mxu3 %v2451_v50 }
 0x494   :  { %v443_v16 = vpop.xlane.xlu2 %442 }
 0x495   :  { %v454_v58 = vmul.f32 %v3485_v57, %v443_v16  ;;  %v2379_v16 = vor.u32 %v3014_v52, %v2376_v54  ;;  %v2406_v52 = vld [vmem:[%s4198_s11 + $0x30] sm:$0xf]  ;;  %v2479_v54 = vor.u32 %v3043_v47, %v2478_v46  ;;  %v3097_v46 = vld [vmem:[%s4200_s13 + $0x1a8] sm:$0xff]  ;;  %v3080_v47 = vld [vmem:[%s4200_s13 + $0x120] sm:$0xff] }
 0x497   :  { %v3488_v59 = vsub.f32 %v437_v45, %v454_v58  ;;  %v2447_v45 = vor.u32 %v3039_v43, %v2446_v42  ;;  %v3015_v58 = vld [vmem:[%s4198_s11 + $0x1c] sm:$0xf]  ;;  %811 = vmatpush.bf16.msrb.mxu2 %v2379_v16  ;;  %v2470_v42 = vld [vmem:[%s4198_s11 + $0xb0] sm:$0xf]  ;;  %v2408_v16 = vld [vmem:[%s4198_s11 + $0x70] sm:$0xf0] }
 0x498   :  { %v3042_v43 = vld [vmem:[%s4198_s11 + $0xec] sm:$0xf0] }
 0x499   :  { %v458_v18 = vmul.f32 %v3488_v59, %v3488_v59  ;;  %824 = vmatpush.bf16.msrb.mxu0 %v2447_v45  ;;  %v2472_v45 = vld [vmem:[%s4198_s11 + $0xf0] sm:$0xf0]  ;;  %v2471_v50 = vor.u32 %v3042_v43, %v2470_v42 }
 0x49a   :  { %v2475_v51 = vor.u32 %v3034_v44, %v2472_v45  ;;  %v3098_v42 = vld [vmem:[%s4200_s13 + $0x1b0] sm:$0xff]  ;;  %v3081_v45 = vld [vmem:[%s4200_s13 + $0x128] sm:$0xff] }
 0x49b   :  { %v460_v60 = vsel %vm68_vm0, %v458_v18, 0.0  ;;  %v2384_v18 = vld [vmem:[%s4198_s11 + $0x58] sm:$0xf0]  ;;  %v3090_v43 = vld [vmem:[%s4200_s13 + $0x170] sm:$0xff] }
 0x49c   :  { %461 = vadd.xlane.f32.xlu1 %v460_v60  ;;  %v2383_v60 = vor.u32 %v3023_v56, %v2382_v55  ;;  %v3018_v56 = vld [vmem:[%s4198_s11 + $0x34] sm:$0xf] }
 0x49d   :  { %v3106_v44 = vld [vmem:[%s4200_s13 + $0x1f0] sm:$0xff] }
 0x49e   :  { %825 = vmatpush.bf16.msrb.mxu0 %v2383_v60  ;;  %v3019_v60 = vld [vmem:[%s4198_s11 + $0x3c] sm:$0xf] }
 0x4aa   :  { %v446_v61 = vpop.xlane.xlu0 %445 }
 0x4ab   :  { %v455_v62 = vmul.f32 %v3485_v57, %v446_v61  ;;  %v2387_v61 = vor.u32 %v3015_v58, %v2384_v18  ;;  %v2414_v58 = vld [vmem:[%s4198_s11 + $0x38] sm:$0xf] }
 0x4ac   :  { %v3027_v18 = vld [vmem:[%s4198_s11 + $0x74] sm:$0xf0] }
 0x4ad   :  { %v3494_v63 = vsub.f32 %v438_v49, %v455_v62  ;;  %839 = vmatpush.bf16.msrb.mxu3 %v2387_v61  ;;  %v2416_v61 = vld [vmem:[%s4198_s11 + $0x78] sm:$0xf0] }
 0x4af   :  { %v459_v0 = vmul.f32 %v3494_v63, %v3494_v63 }
 0x4b1   :  { %v463_v1 = vsel %vm68_vm0, %v459_v0, 0.0 }
 0x4b2   :  { %464 = vadd.xlane.f32.xlu2 %v463_v1 }
 0x50f   :  { %v462_v2 = vpop.xlane.xlu1 %461 }
 0x510   :  { %v466_v3 = vmul.f32 %v462_v2, %v3485_v57 }
 0x512   :  { %v3500_v4 = vadd.f32 1e-05, %v466_v3 }
 0x514   :  { %3217 = vrsqrt.f32 %v3500_v4  ;;  %vm476_vm3 = vweird.f32 %v3500_v4 }
 0x51a   :  { %v3503_v5 = vpop.eup %3217 }
 0x51b   :  { %v471_v9 = vmul.f32 %v3503_v5, %v3500_v4  ;;  %vm477_vm2 = vweird.f32 %v3503_v5  ;;  %v3203_v4 = vld [vmem:[%s4197_s10] ss:$0 sm:$0xff] }
 0x51c   :  { %vm478_vm4 = vmor %vm476_vm3, %vm477_vm2 }
 0x51d   :  { %v472_v23 = vmul.f32 %v3503_v5, %v471_v9  ;;  %v3202_v9 = vld [vmem:[%s4196_s9] ss:$0 sm:$0xff] }
 0x51f   :  { %v473_v34 = vmul.f32 0.5, %v472_v23  ;;  %v3033_v23 = vld [vmem:[%s4198_s11 + $0xac] sm:$0xf] }
 0x520   :  { %v2467_v31 = vor.u32 %v3033_v23, %v2464_v24  ;;  %v3055_v23 = vld [vmem:[%s4200_s13 + $0x58] sm:$0xff] }
 0x521   :  { %v474_v62 = vsub.f32 1.5, %v473_v34  ;;  %v2398_v34 = vld [vmem:[%s4198_s11 + $0x28] sm:$0xf]  ;;  %v3071_v24 = vld [vmem:[%s4200_s13 + $0xd8] sm:$0xff] }
 0x523   :  { %v475_v1 = vmul.f32 %v3503_v5, %v474_v62  ;;  %v2407_v62 = vor.u32 %v3026_v53, %v2406_v52  ;;  %v3095_v52 = vld [vmem:[%s4200_s13 + $0x198] sm:$0xff]  ;;  %v3088_v53 = vld [vmem:[%s4200_s13 + $0x160] sm:$0xff] }
 0x525   :  { %v465_v35 = vpop.xlane.xlu2 %464  ;;  %v479_v6 = vsel %vm478_vm4, %v3503_v5, %v475_v1  ;;  %v2415_v1 = vor.u32 %v3027_v18, %v2414_v58  ;;  %v3103_v58 = vld [vmem:[%s4200_s13 + $0x1d8] sm:$0xff]  ;;  %v3077_v18 = vld [vmem:[%s4200_s13 + $0x108] sm:$0xff] }
 0x526   :  { %v467_v39 = vmul.f32 %v465_v35, %v3485_v57  ;;  %v490_v10 = vmul.f32 %v479_v6, %v3488_v59  ;;  %v3040_v59 = vld [vmem:[%s4198_s11 + $0xdc] sm:$0xf0]  ;;  %v3025_v35 = vld [vmem:[%s4198_s11 + $0x64] sm:$0xf0]  ;;  %v3067_v6 = vld [vmem:[%s4200_s13 + $0xb8] sm:$0xff] }
 0x527   :  { %v2455_v26 = vor.u32 %v3040_v59, %v2454_v15  ;;  %v2399_v40 = vor.u32 %v3025_v35, %v2398_v34  ;;  %v3048_v15 = vld [vmem:[%s4200_s13 + $0x20] sm:$0xff]  ;;  %v3083_v35 = vld [vmem:[%s4200_s13 + $0x138] sm:$0xff] }
 0x528   :  { %v469_v49 = vadd.f32 1e-05, %v467_v39  ;;  %v495_v13 = vmul.f32 %v3202_v9, %v490_v10  ;;  %v2395_v39 = vor.u32 %v3016_v32, %v2392_v33  ;;  %v3066_v10 = vld [vmem:[%s4200_s13 + $0xb0] sm:$0xff]  ;;  %v3064_v59 = vld [vmem:[%s4200_s13 + $0xa0] sm:$0xff]  ;;  %v3069_v32 = vld [vmem:[%s4200_s13 + $0xc8] sm:$0xff] }
 0x529   :  { %v3044_v33 = vld [vmem:[%s4200_s13] sm:$0xff] }
 0x52a   :  { %3219 = vrsqrt.f32 %v469_v49  ;;  %vm486_vm6 = vweird.f32 %v469_v49  ;;  %v3632_v20 = vadd.f32 %v3203_v4, %v495_v13  ;;  %v3065_v13 = vld [vmem:[%s4200_s13 + $0xa8] sm:$0xff]  ;;  %v3060_v34 = vld [vmem:[%s4200_s13 + $0x80] sm:$0xff] }
 0x530   :  { %v3220_v0 = vpop.eup %3219 }
 0x531   :  { %v481_v2 = vmul.f32 %v3220_v0, %v469_v49  ;;  %vm487_vm5 = vweird.f32 %v3220_v0  ;;  %v2480_v49 = vld [vmem:[%s4198_s11 + $0xf8] sm:$0xf0] }
 0x532   :  { %vm488_vm7 = vmor %vm486_vm6, %vm487_vm5  ;;  %v2483_v55 = vor.u32 %v3035_v48, %v2480_v49  ;;  %v3096_v48 = vld [vmem:[%s4200_s13 + $0x1a0] sm:$0xff]  ;;  %v3089_v49 = vld [vmem:[%s4200_s13 + $0x168] sm:$0xff] }
 0x533   :  { %v482_v3 = vmul.f32 %v3220_v0, %v481_v2  ;;  %v2419_v2 = vor.u32 %v3019_v60, %v2416_v61  ;;  %v3093_v60 = vld [vmem:[%s4200_s13 + $0x188] sm:$0xff]  ;;  %v3086_v61 = vld [vmem:[%s4200_s13 + $0x150] sm:$0xff] }
 0x535   :  { %v483_v7 = vmul.f32 0.5, %v482_v3  ;;  %v3051_v3 = vld [vmem:[%s4200_s13 + $0x38] sm:$0xff] }
 0x537   :  { %v484_v8 = vsub.f32 1.5, %v483_v7  ;;  %v3059_v7 = vld [vmem:[%s4200_s13 + $0x78] sm:$0xff] }
 0x539   :  { %v485_v11 = vmul.f32 %v3220_v0, %v484_v8  ;;  %v3075_v8 = vld [vmem:[%s4200_s13 + $0xf8] sm:$0xff] }
 0x53b   :  { %v489_v12 = vsel %vm488_vm7, %v3220_v0, %v485_v11  ;;  %v2411_v0 = vor.u32 %v3018_v56, %v2408_v16  ;;  %v3058_v11 = vld [vmem:[%s4200_s13 + $0x70] sm:$0xff]  ;;  %v3087_v16 = vld [vmem:[%s4200_s13 + $0x158] sm:$0xff] }
 0x53c   :  { %v491_v5 = vmul.f32 %v489_v12, %v3494_v63  ;;  %v2462_v63 = vld [vmem:[%s4198_s11 + $0xa8] sm:$0xf]  ;;  %v3074_v12 = vld [vmem:[%s4200_s13 + $0xf0] sm:$0xff] }
 0x53d   :  { %v2463_v30 = vor.u32 %v3041_v22, %v2462_v63  ;;  %v3047_v63 = vld [vmem:[%s4200_s13 + $0x18] sm:$0xff]  ;;  %v3094_v56 = vld [vmem:[%s4200_s13 + $0x190] sm:$0xff] }
 0x53e   :  { %v496_v14 = vmul.f32 %v3202_v9, %v491_v5  ;;  %v3050_v9 = vld [vmem:[%s4200_s13 + $0x30] sm:$0xff]  ;;  %v3057_v5 = vld [vmem:[%s4200_s13 + $0x68] sm:$0xff]  ;;  %v3063_v22 = vld [vmem:[%s4200_s13 + $0x98] sm:$0xff] }
 0x540   :  { %v3634_v21 = vadd.f32 %v3203_v4, %v496_v14  ;;  %v3049_v4 = vld [vmem:[%s4200_s13 + $0x28] sm:$0xff] }
 0x541   :  { %v3073_v14 = vld [vmem:[%s4200_s13 + $0xe8] sm:$0xff] }
 0x542   :  { %v3647_v25 = vpack.c.bf16 %v3634_v21, %v3632_v20 }
 0x544   :  { %2484 = vmatmul.msk.bf16.vlgmr.msra.gmra.mxu1 %vm68_vm0, %v3647_v25  ;;  %2485 = vmatmul.msk.bf16.vlgmr.msra.gmra.mxu2 %vm68_vm0, %v3647_v25 }
 0x545   :  { %2486 = vmatmul.msk.bf16.vlgmr.msra.gmra.mxu0 %vm68_vm0, %v3647_v25  ;;  %2487 = vmatmul.msk.bf16.vlgmr.msra.gmra.mxu3 %vm68_vm0, %v3647_v25 }
 0x546   :  { %852 = vmatpush.bf16.msra.mxu1 %v2455_v26  ;;  %866 = vmatpush.bf16.msra.mxu2 %v2459_v27  ;;  %v3046_v26 = vld [vmem:[%s4200_s13 + $0x10] sm:$0xff] }
 0x547   :  { %880 = vmatpush.bf16.msra.mxu0 %v2463_v30  ;;  %894 = vmatpush.bf16.msra.mxu3 %v2467_v31  ;;  %v3062_v27 = vld [vmem:[%s4200_s13 + $0x90] sm:$0xff]  ;;  %v3061_v30 = vld [vmem:[%s4200_s13 + $0x88] sm:$0xff] }
 0x548   :  { %v3053_v31 = vld [vmem:[%s4200_s13 + $0x48] sm:$0xff] }
 0x54a   :  { %853 = vmatpush.bf16.msra.mxu1 %v2391_v38  ;;  %867 = vmatpush.bf16.msra.mxu2 %v2395_v39  ;;  %v3068_v38 = vld [vmem:[%s4200_s13 + $0xc0] sm:$0xff]  ;;  %v3091_v39 = vld [vmem:[%s4200_s13 + $0x178] sm:$0xff] }
 0x54b   :  { %881 = vmatpush.bf16.msra.mxu0 %v2399_v40  ;;  %895 = vmatpush.bf16.msra.mxu3 %v2403_v41  ;;  %v3107_v40 = vld [vmem:[%s4200_s13 + $0x1f8] sm:$0xff]  ;;  %v3082_v41 = vld [vmem:[%s4200_s13 + $0x130] sm:$0xff] }
 0x554   :  { %2488 = vmatmul.msk.bf16.vlgmr.msrb.gmra.mxu1 %vm68_vm0, %v3647_v25  ;;  %2489 = vmatmul.msk.bf16.vlgmr.msrb.gmra.mxu2 %vm68_vm0, %v3647_v25 }
 0x555   :  { %2490 = vmatmul.msk.bf16.vlgmr.msrb.gmra.mxu0 %vm68_vm0, %v3647_v25  ;;  %2491 = vmatmul.msk.bf16.vlgmr.msrb.gmra.mxu3 %vm68_vm0, %v3647_v25 }
 0x556   :  { %908 = vmatpush.bf16.msrb.mxu1 %v2471_v50  ;;  %922 = vmatpush.bf16.msrb.mxu2 %v2475_v51  ;;  %v3105_v50 = vld [vmem:[%s4200_s13 + $0x1e8] sm:$0xff]  ;;  %v3079_v51 = vld [vmem:[%s4200_s13 + $0x118] sm:$0xff] }
 0x557   :  { %936 = vmatpush.bf16.msrb.mxu0 %v2479_v54  ;;  %950 = vmatpush.bf16.msrb.mxu3 %v2483_v55  ;;  %v3104_v54 = vld [vmem:[%s4200_s13 + $0x1e0] sm:$0xff]  ;;  %v3078_v55 = vld [vmem:[%s4200_s13 + $0x110] sm:$0xff] }
 0x55a   :  { %909 = vmatpush.bf16.msrb.mxu1 %v2407_v62  ;;  %923 = vmatpush.bf16.msrb.mxu2 %v2411_v0  ;;  %v3102_v62 = vld [vmem:[%s4200_s13 + $0x1d0] sm:$0xff]  ;;  %v3076_v0 = vld [vmem:[%s4200_s13 + $0x100] sm:$0xff] }
 0x55b   :  { %937 = vmatpush.bf16.msrb.mxu0 %v2415_v1  ;;  %951 = vmatpush.bf16.msrb.mxu3 %v2419_v2  ;;  %v3092_v1 = vld [vmem:[%s4200_s13 + $0x180] sm:$0xff]  ;;  %v3085_v2 = vld [vmem:[%s4200_s13 + $0x148] sm:$0xff] }
 0x564   :  { %2492 = vmatmul.msk.bf16.vlgmr.msra.gmra.mxu1 %vm68_vm0, %v3647_v25  ;;  %2493 = vmatmul.msk.bf16.vlgmr.msra.gmra.mxu2 %vm68_vm0, %v3647_v25 }
 0x565   :  { %2494 = vmatmul.msk.bf16.vlgmr.msra.gmra.mxu0 %vm68_vm0, %v3647_v25  ;;  %2495 = vmatmul.msk.bf16.vlgmr.msra.gmra.mxu3 %vm68_vm0, %v3647_v25 }
 0x566   :  { %2034 = vmatpush.bf16.msra.mxu1 %v3051_v3  ;;  %2062 = vmatpush.bf16.msra.mxu0 %v3067_v6  ;;  %v3101_v3 = vld [vmem:[%s4200_s13 + $0x1c8] sm:$0xff]  ;;  %v3084_v6 = vld [vmem:[%s4200_s13 + $0x140] sm:$0xff] }
 0x567   :  { %2048 = vmatpush.bf16.msra.mxu2 %v3059_v7  ;;  %2076 = vmatpush.bf16.msra.mxu3 %v3075_v8  ;;  %v3100_v7 = vld [vmem:[%s4200_s13 + $0x1c0] sm:$0xff] }
 0x568   :  { %v3948_v8 = vld [vmem:[%s4199_s12] sm:$0xff] }
 0x56a   :  { %2035 = vmatpush.bf16.msra.mxu1 %v3050_v9  ;;  %2063 = vmatpush.bf16.msra.mxu0 %v3066_v10 }
 0x56b   :  { %2049 = vmatpush.bf16.msra.mxu2 %v3058_v11  ;;  %2077 = vmatpush.bf16.msra.mxu3 %v3074_v12  ;;  %v539_v11 = vperm.slane %v3948_v8, 0  ;;  %v541_v12 = vperm.slane %v3948_v8, 2 }
 0x56e   :  { %2036 = vmatpush.bf16.msra.mxu1 %v3049_v4  ;;  %2064 = vmatpush.bf16.msra.mxu0 %v3065_v13 }
 0x56f   :  { %2050 = vmatpush.bf16.msra.mxu2 %v3057_v5  ;;  %2078 = vmatpush.bf16.msra.mxu3 %v3073_v14 }
 0x572   :  { %2037 = vmatpush.bf16.msra.mxu1 %v3048_v15  ;;  %2065 = vmatpush.bf16.msra.mxu0 %v3064_v59  ;;  %v540_v59 = vperm.slane %v3948_v8, 1 }
 0x573   :  { %2051 = vmatpush.bf16.msra.mxu2 %v3056_v17  ;;  %2079 = vmatpush.bf16.msra.mxu3 %v3072_v19 }
 0x574   :  { %2496 = vmatmul.msk.bf16.vlgmr.msrb.gmra.mxu1 %vm68_vm0, %v3647_v25  ;;  %2497 = vmatmul.msk.bf16.vlgmr.msrb.gmra.mxu2 %vm68_vm0, %v3647_v25 }
 0x575   :  { %2498 = vmatmul.msk.bf16.vlgmr.msrb.gmra.mxu0 %vm68_vm0, %v3647_v25  ;;  %2499 = vmatmul.msk.bf16.vlgmr.msrb.gmra.mxu3 %vm68_vm0, %v3647_v25  ;;  %v3070_v25 = vld [vmem:[%s4200_s13 + $0xd0] sm:$0xff] }
 0x576   :  { %2038 = vmatpush.bf16.msra.mxu1 %v3047_v63  ;;  %2066 = vmatpush.bf16.msra.mxu0 %v3063_v22  ;;  %v542_v63 = vperm.slane %v3948_v8, 3 }
 0x577   :  { %2052 = vmatpush.bf16.msra.mxu2 %v3055_v23  ;;  %2080 = vmatpush.bf16.msra.mxu3 %v3071_v24 }
 0x57a   :  { %2039 = vmatpush.bf16.msra.mxu1 %v3046_v26  ;;  %2067 = vmatpush.bf16.msra.mxu0 %v3062_v27 }
 0x57b   :  { %2053 = vmatpush.bf16.msra.mxu2 %v3054_v28  ;;  %2081 = vmatpush.bf16.msra.mxu3 %v3070_v25  ;;  %v3115_v28 = vld [vmem:[%s4200_s13 + $0x238] sm:$0xff] }
 0x57e   :  { %2040 = vmatpush.bf16.msra.mxu1 %v3045_v29  ;;  %2068 = vmatpush.bf16.msra.mxu0 %v3061_v30  ;;  %v3131_v30 = vld [vmem:[%s4200_s13 + $0x2b8] sm:$0xff] }
 0x57f   :  { %2054 = vmatpush.bf16.msra.mxu2 %v3053_v31  ;;  %2082 = vmatpush.bf16.msra.mxu3 %v3069_v32 }
 0x582   :  { %2041 = vmatpush.bf16.msra.mxu1 %v3044_v33  ;;  %2069 = vmatpush.bf16.msra.mxu0 %v3060_v34 }
 0x583   :  { %2055 = vmatpush.bf16.msra.mxu2 %v3052_v37  ;;  %2083 = vmatpush.bf16.msra.mxu3 %v3068_v38  ;;  %v3114_v38 = vld [vmem:[%s4200_s13 + $0x230] sm:$0xff] }
 0x586   :  { %2090 = vmatpush.bf16.msrb.mxu1 %v3083_v35  ;;  %2118 = vmatpush.bf16.msrb.mxu0 %v3099_v36 }
 0x587   :  { %2104 = vmatpush.bf16.msrb.mxu2 %v3091_v39  ;;  %2132 = vmatpush.bf16.msrb.mxu3 %v3107_v40 }
 0x58a   :  { %2091 = vmatpush.bf16.msrb.mxu1 %v3082_v41  ;;  %2119 = vmatpush.bf16.msrb.mxu0 %v3098_v42  ;;  %v3130_v42 = vld [vmem:[%s4200_s13 + $0x2b0] sm:$0xff] }
 0x58b   :  { %2105 = vmatpush.bf16.msrb.mxu2 %v3090_v43  ;;  %2133 = vmatpush.bf16.msrb.mxu3 %v3106_v44 }
 0x58e   :  { %2092 = vmatpush.bf16.msrb.mxu1 %v3081_v45  ;;  %2120 = vmatpush.bf16.msrb.mxu0 %v3097_v46  ;;  %v3123_v45 = vld [vmem:[%s4200_s13 + $0x278] sm:$0xff] }
 0x58f   :  { %2106 = vmatpush.bf16.msrb.mxu2 %v3089_v49  ;;  %2134 = vmatpush.bf16.msrb.mxu3 %v3105_v50  ;;  %v545_v50 = vperm.slane %v3948_v8, 6 }
 0x592   :  { %2093 = vmatpush.bf16.msrb.mxu1 %v3080_v47  ;;  %2121 = vmatpush.bf16.msrb.mxu0 %v3096_v48  ;;  %v543_v47 = vperm.slane %v3948_v8, 4  ;;  %v3139_v48 = vld [vmem:[%s4200_s13 + $0x2f8] sm:$0xff] }
 0x593   :  { %2107 = vmatpush.bf16.msrb.mxu2 %v3088_v53  ;;  %2135 = vmatpush.bf16.msrb.mxu3 %v3104_v54  ;;  %v3122_v54 = vld [vmem:[%s4200_s13 + $0x270] sm:$0xff] }
 0x596   :  { %2094 = vmatpush.bf16.msrb.mxu1 %v3079_v51  ;;  %2122 = vmatpush.bf16.msrb.mxu0 %v3095_v52  ;;  %v3113_v51 = vld [vmem:[%s4200_s13 + $0x228] sm:$0xff] }
 0x597   :  { %2108 = vmatpush.bf16.msrb.mxu2 %v3087_v16  ;;  %2136 = vmatpush.bf16.msrb.mxu3 %v3103_v58  ;;  %v3129_v52 = vld [vmem:[%s4200_s13 + $0x2a8] sm:$0xff]  ;;  %v3138_v16 = vld [vmem:[%s4200_s13 + $0x2f0] sm:$0xff] }
 0x59a   :  { %2095 = vmatpush.bf16.msrb.mxu1 %v3078_v55  ;;  %2123 = vmatpush.bf16.msrb.mxu0 %v3094_v56 }
 0x59b   :  { %2109 = vmatpush.bf16.msrb.mxu2 %v3086_v61  ;;  %2137 = vmatpush.bf16.msrb.mxu3 %v3102_v62  ;;  %v544_v61 = vperm.slane %v3948_v8, 5 }
 0x59e   :  { %2096 = vmatpush.bf16.msrb.mxu1 %v3077_v18  ;;  %2124 = vmatpush.bf16.msrb.mxu0 %v3093_v60  ;;  %v3112_v60 = vld [vmem:[%s4200_s13 + $0x220] sm:$0xff] }
 0x59f   :  { %2110 = vmatpush.bf16.msrb.mxu2 %v3085_v2  ;;  %2138 = vmatpush.bf16.msrb.mxu3 %v3101_v3  ;;  %v546_v2 = vperm.slane %v3948_v8, 7  ;;  %v3111_v8 = vld [vmem:[%s4200_s13 + $0x218] sm:$0xff] }
 0x5a2   :  { %2097 = vmatpush.bf16.msrb.mxu1 %v3076_v0  ;;  %2125 = vmatpush.bf16.msrb.mxu0 %v3092_v1  ;;  %v3128_v1 = vld [vmem:[%s4200_s13 + $0x2a0] sm:$0xff] }
 0x5a3   :  { %2111 = vmatpush.bf16.msrb.mxu2 %v3084_v6  ;;  %2139 = vmatpush.bf16.msrb.mxu3 %v3100_v7  ;;  %v3121_v6 = vld [vmem:[%s4200_s13 + $0x268] sm:$0xff] }
 0x5c1   :  { %v743_v9 = vpop.f32.mrf.mxu1 }
 0x5c2   :  { %v771_v10 = vpop.f32.mrf.mxu0  ;;  %v744_v13 = vadd.f32 %v743_v9, %v539_v11 }
 0x5c3   :  { %v772_v14 = vadd.f32 %v771_v10, %v541_v12  ;;  %v3137_v10 = vld [vmem:[%s4200_s13 + $0x2e8] sm:$0xff] }
 0x5c4   :  { %v958_v23 = vmax.f32 %v744_v13, 0.0 }
 0x5c5   :  { %v960_v26 = vmax.f32 %v772_v14, 0.0 }
 0x5c7   :  { %v757_v4 = vpop.f32.mrf.mxu2 }
 0x5c8   :  { %v785_v5 = vpop.f32.mrf.mxu3  ;;  %v758_v25 = vadd.f32 %v757_v4, %v540_v59 }
 0x5c9   :  { %v745_v15 = vpop.f32.mrf.mxu1  ;;  %v786_v31 = vadd.f32 %v785_v5, %v542_v63  ;;  %v3127_v5 = vld [vmem:[%s4200_s13 + $0x298] sm:$0xff] }
 0x5ca   :  { %v746_v17 = vadd.f32 %v745_v15, %v539_v11  ;;  %v773_v19 = vpop.f32.mrf.mxu0  ;;  %v959_v39 = vmax.f32 %v758_v25, 0.0 }
 0x5cb   :  { %v774_v22 = vadd.f32 %v773_v19, %v541_v12  ;;  %v961_v43 = vmax.f32 %v786_v31, 0.0 }
 0x5cc   :  { %v974_v24 = vmax.f32 %v746_v17, 0.0  ;;  %v3120_v17 = vld [vmem:[%s4200_s13 + $0x260] sm:$0xff] }
 0x5cd   :  { %v976_v27 = vmax.f32 %v774_v22, 0.0  ;;  %v3136_v22 = vld [vmem:[%s4200_s13 + $0x2e0] sm:$0xff] }
 0x5ce   :  { %v990_v29 = vpack.c.bf16 %v974_v24, %v958_v23  ;;  %v4015_v24 = vld [vmem:[%s4199_s12 + $0x8] sm:$0xff] }
 0x5cf   :  { %v992_v32 = vpack.c.bf16 %v976_v27, %v960_v26  ;;  %v759_v33 = vpop.f32.mrf.mxu2  ;;  %v3110_v27 = vld [vmem:[%s4200_s13 + $0x210] sm:$0xff] }
 0x5d0   :  { %v760_v34 = vadd.f32 %v759_v33, %v540_v59  ;;  %v787_v35 = vpop.f32.mrf.mxu3  ;;  %2042 = vmatmul.bf16.vlgmr.msra.gmra.mxu1 %v990_v29  ;;  %v3119_v33 = vld [vmem:[%s4200_s13 + $0x258] sm:$0xff] }
 0x5d1   :  { %v788_v36 = vadd.f32 %v787_v35, %v542_v63  ;;  %2070 = vmatmul.bf16.vlgmr.msra.gmra.mxu0 %v992_v32  ;;  %2146 = vmatpush.bf16.msra.mxu1 %v3115_v28  ;;  %v799_v37 = vpop.f32.mrf.mxu1  ;;  %v547_v35 = vperm.slane %v4015_v24, 0 }
 0x5d2   :  { %v975_v40 = vmax.f32 %v760_v34, 0.0  ;;  %2174 = vmatpush.bf16.msra.mxu0 %v3131_v30  ;;  %v827_v41 = vpop.f32.mrf.mxu0  ;;  %v800_v55 = vadd.f32 %v799_v37, %v543_v47  ;;  %v3126_v30 = vld [vmem:[%s4200_s13 + $0x290] sm:$0xff] }
 0x5d3   :  { %v977_v44 = vmax.f32 %v788_v36, 0.0  ;;  %v828_v58 = vadd.f32 %v827_v41, %v545_v50  ;;  %v3135_v36 = vld [vmem:[%s4200_s13 + $0x2d8] sm:$0xff] }
 0x5d4   :  { %v991_v46 = vpack.c.bf16 %v975_v40, %v959_v39  ;;  %v962_v7 = vmax.f32 %v800_v55, 0.0  ;;  %v3109_v39 = vld [vmem:[%s4200_s13 + $0x208] sm:$0xff] }
 0x5d5   :  { %v993_v49 = vpack.c.bf16 %v977_v44, %v961_v43  ;;  %2147 = vmatpush.bf16.msra.mxu1 %v3114_v38  ;;  %v964_v11 = vmax.f32 %v828_v58, 0.0  ;;  %v549_v38 = vperm.slane %v4015_v24, 2  ;;  %v3125_v40 = vld [vmem:[%s4200_s13 + $0x288] sm:$0xff] }
 0x5d6   :  { %2175 = vmatpush.bf16.msra.mxu0 %v3130_v42  ;;  %2056 = vmatmul.bf16.vlgmr.msra.gmra.mxu2 %v991_v46  ;;  %v3118_v42 = vld [vmem:[%s4200_s13 + $0x250] sm:$0xff] }
 0x5d7   :  { %2084 = vmatmul.bf16.vlgmr.msra.gmra.mxu3 %v993_v49  ;;  %2160 = vmatpush.bf16.msra.mxu2 %v3123_v45  ;;  %v813_v53 = vpop.f32.mrf.mxu2  ;;  %v3134_v45 = vld [vmem:[%s4200_s13 + $0x2d0] sm:$0xff]  ;;  %v548_v49 = vperm.slane %v4015_v24, 1 }
 0x5d8   :  { %2188 = vmatpush.bf16.msra.mxu3 %v3139_v48  ;;  %v841_v56 = vpop.f32.mrf.mxu3  ;;  %v814_v4 = vadd.f32 %v813_v53, %v544_v61  ;;  %v3108_v48 = vld [vmem:[%s4200_s13 + $0x200] sm:$0xff]  ;;  %v3147_v53 = vld [vmem:[%s4200_s13 + $0x338] sm:$0xff] }
 0x5d9   :  { %2148 = vmatpush.bf16.msra.mxu1 %v3113_v51  ;;  %v801_v18 = vpop.f32.mrf.mxu1  ;;  %v842_v14 = vadd.f32 %v841_v56, %v546_v2  ;;  %v3163_v56 = vld [vmem:[%s4200_s13 + $0x3b8] sm:$0xff] }
 0x5da   :  { %2176 = vmatpush.bf16.msra.mxu0 %v3129_v52  ;;  %v802_v62 = vadd.f32 %v801_v18, %v543_v47  ;;  %v829_v0 = vpop.f32.mrf.mxu0  ;;  %v963_v28 = vmax.f32 %v814_v4, 0.0  ;;  %v3124_v52 = vld [vmem:[%s4200_s13 + $0x280] sm:$0xff]  ;;  %v3155_v4 = vld [vmem:[%s4200_s13 + $0x378] sm:$0xff] }
 0x5db   :  { %v830_v3 = vadd.f32 %v829_v0, %v545_v50  ;;  %2161 = vmatpush.bf16.msra.mxu2 %v3122_v54  ;;  %v965_v31 = vmax.f32 %v842_v14, 0.0  ;;  %v550_v54 = vperm.slane %v4015_v24, 3 }
 0x5dc   :  { %v978_v9 = vmax.f32 %v802_v62, 0.0  ;;  %2189 = vmatpush.bf16.msra.mxu3 %v3138_v16  ;;  %v3117_v16 = vld [vmem:[%s4200_s13 + $0x248] sm:$0xff] }
 0x5dd   :  { %v980_v12 = vmax.f32 %v830_v3, 0.0  ;;  %2149 = vmatpush.bf16.msra.mxu1 %v3112_v60  ;;  %v3133_v60 = vld [vmem:[%s4200_s13 + $0x2c8] sm:$0xff] }
 0x5de   :  { %v994_v13 = vpack.c.bf16 %v978_v9, %v962_v7  ;;  %2177 = vmatpush.bf16.msra.mxu0 %v3128_v1  ;;  %v3162_v9 = vld [vmem:[%s4200_s13 + $0x3b0] sm:$0xff] }
 0x5df   :  { %v996_v15 = vpack.c.bf16 %v980_v12, %v964_v11  ;;  %2162 = vmatpush.bf16.msra.mxu2 %v3121_v6  ;;  %v815_v59 = vpop.f32.mrf.mxu2 }
 0x5e0   :  { %2190 = vmatpush.bf16.msra.mxu3 %v3137_v10  ;;  %v816_v19 = vadd.f32 %v815_v59, %v544_v61  ;;  %v843_v63 = vpop.f32.mrf.mxu3  ;;  %2098 = vmatmul.bf16.vlgmr.msrb.gmra.mxu1 %v994_v13  ;;  %v3116_v10 = vld [vmem:[%s4200_s13 + $0x240] sm:$0xff]  ;;  %v3145_v59 = vld [vmem:[%s4200_s13 + $0x328] sm:$0xff] }
 0x5e1   :  { %v844_v23 = vadd.f32 %v843_v63, %v546_v2  ;;  %2126 = vmatmul.bf16.vlgmr.msrb.gmra.mxu0 %v996_v15  ;;  %2150 = vmatpush.bf16.msra.mxu1 %v3111_v8  ;;  %v855_v26 = vpop.f32.mrf.mxu1  ;;  %v3146_v2 = vld [vmem:[%s4200_s13 + $0x330] sm:$0xff]  ;;  %v3132_v8 = vld [vmem:[%s4200_s13 + $0x2c0] sm:$0xff]  ;;  %v3161_v63 = vld [vmem:[%s4200_s13 + $0x3a8] sm:$0xff] }
 0x5e2   :  { %v979_v25 = vmax.f32 %v816_v19, 0.0  ;;  %2178 = vmatpush.bf16.msra.mxu0 %v3127_v5  ;;  %v883_v29 = vpop.f32.mrf.mxu0  ;;  %v856_v43 = vadd.f32 %v855_v26, %v547_v35  ;;  %v3171_v5 = vld [vmem:[%s4200_s13 + $0x3f8] sm:$0xff] }
 0x5e3   :  { %v981_v32 = vmax.f32 %v844_v23, 0.0  ;;  %2163 = vmatpush.bf16.msra.mxu2 %v3120_v17  ;;  %v884_v46 = vadd.f32 %v883_v29, %v549_v38  ;;  %v3154_v23 = vld [vmem:[%s4200_s13 + $0x370] sm:$0xff] }
 0x5e4   :  { %v995_v34 = vpack.c.bf16 %v979_v25, %v963_v28  ;;  %2191 = vmatpush.bf16.msra.mxu3 %v3136_v22  ;;  %v966_v58 = vmax.f32 %v856_v43, 0.0  ;;  %v3144_v25 = vld [vmem:[%s4200_s13 + $0x320] sm:$0xff]  ;;  %v551_v43 = vperm.slane %v4015_v24, 4 }
 0x5e5   :  { %v997_v37 = vpack.c.bf16 %v981_v32, %v965_v31  ;;  %2151 = vmatpush.bf16.msra.mxu1 %v3110_v27  ;;  %v968_v61 = vmax.f32 %v884_v46, 0.0  ;;  %v3170_v27 = vld [vmem:[%s4200_s13 + $0x3f0] sm:$0xff]  ;;  %v3153_v31 = vld [vmem:[%s4200_s13 + $0x368] sm:$0xff]  ;;  %v553_v46 = vperm.slane %v4015_v24, 6 }
 0x5e6   :  { %2179 = vmatpush.bf16.msra.mxu0 %v3126_v30  ;;  %2112 = vmatmul.bf16.vlgmr.msrb.gmra.mxu2 %v995_v34  ;;  %v3160_v30 = vld [vmem:[%s4200_s13 + $0x3a0] sm:$0xff]  ;;  %v3169_v32 = vld [vmem:[%s4200_s13 + $0x3e8] sm:$0xff]  ;;  %v3159_v34 = vld [vmem:[%s4200_s13 + $0x398] sm:$0xff] }
 0x5e7   :  { %2140 = vmatmul.bf16.vlgmr.msrb.gmra.mxu3 %v997_v37  ;;  %2164 = vmatpush.bf16.msra.mxu2 %v3119_v33  ;;  %v869_v41 = vpop.f32.mrf.mxu2  ;;  %v3143_v33 = vld [vmem:[%s4200_s13 + $0x318] sm:$0xff] }
 0x5e8   :  { %2192 = vmatpush.bf16.msra.mxu3 %v3135_v36  ;;  %v897_v44 = vpop.f32.mrf.mxu3  ;;  %v870_v0 = vadd.f32 %v869_v41, %v548_v49  ;;  %v3152_v36 = vld [vmem:[%s4200_s13 + $0x360] sm:$0xff] }
 0x5e9   :  { %2152 = vmatpush.bf16.msra.mxu1 %v3109_v39  ;;  %v857_v47 = vpop.f32.mrf.mxu1  ;;  %v898_v3 = vadd.f32 %v897_v44, %v550_v54  ;;  %v3142_v39 = vld [vmem:[%s4200_s13 + $0x310] sm:$0xff] }
 0x5ea   :  { %2180 = vmatpush.bf16.msra.mxu0 %v3125_v40  ;;  %v858_v50 = vadd.f32 %v857_v47, %v547_v35  ;;  %v885_v51 = vpop.f32.mrf.mxu0  ;;  %v967_v14 = vmax.f32 %v870_v0, 0.0  ;;  %v3158_v40 = vld [vmem:[%s4200_s13 + $0x390] sm:$0xff]  ;;  %v3141_v47 = vld [vmem:[%s4200_s13 + $0x308] sm:$0xff] }
 0x5eb   :  { %v886_v55 = vadd.f32 %v885_v51, %v549_v38  ;;  %2165 = vmatpush.bf16.msra.mxu2 %v3118_v42  ;;  %v969_v17 = vmax.f32 %v898_v3, 0.0  ;;  %v3168_v38 = vld [vmem:[%s4200_s13 + $0x3e0] sm:$0xff]  ;;  %v3151_v42 = vld [vmem:[%s4200_s13 + $0x358] sm:$0xff]  ;;  %v3150_v51 = vld [vmem:[%s4200_s13 + $0x350] sm:$0xff] }
 0x5ec   :  { %v982_v18 = vmax.f32 %v858_v50, 0.0  ;;  %2193 = vmatpush.bf16.msra.mxu3 %v3134_v45  ;;  %v3167_v45 = vld [vmem:[%s4200_s13 + $0x3d8] sm:$0xff]  ;;  %v3149_v0 = vld [vmem:[%s4200_s13 + $0x348] sm:$0xff] }
 0x5ed   :  { %v984_v62 = vmax.f32 %v886_v55, 0.0  ;;  %2153 = vmatpush.bf16.msra.mxu1 %v3108_v48  ;;  %v3165_v3 = vld [vmem:[%s4200_s13 + $0x3c8] sm:$0xff] }
 0x5ee   :  { %v998_v1 = vpack.c.bf16 %v982_v18, %v966_v58  ;;  %2181 = vmatpush.bf16.msra.mxu0 %v3124_v52 }
 0x5ef   :  { %v1000_v6 = vpack.c.bf16 %v984_v62, %v968_v61  ;;  %2166 = vmatpush.bf16.msra.mxu2 %v3117_v16  ;;  %v871_v7 = vpop.f32.mrf.mxu2  ;;  %v552_v16 = vperm.slane %v4015_v24, 5  ;;  %v554_v61 = vperm.slane %v4015_v24, 7 }
 0x5f0   :  { %2194 = vmatpush.bf16.msra.mxu3 %v3133_v60  ;;  %v872_v11 = vadd.f32 %v871_v7, %v548_v49  ;;  %v899_v12 = vpop.f32.mrf.mxu3  ;;  %2154 = vmatmul.bf16.vlgmr.msra.gmra.mxu1 %v998_v1  ;;  %v3157_v49 = vld [vmem:[%s4200_s13 + $0x388] sm:$0xff]  ;;  %v3156_v60 = vld [vmem:[%s4200_s13 + $0x380] sm:$0xff] }
 0x5f1   :  { %2202 = vmatpush.bf16.msrb.mxu1 %v3147_v53  ;;  %v900_v13 = vadd.f32 %v899_v12, %v550_v54  ;;  %2182 = vmatmul.bf16.vlgmr.msra.gmra.mxu0 %v1000_v6  ;;  %v911_v28 = vpop.f32.mrf.mxu1  ;;  %v3166_v53 = vld [vmem:[%s4200_s13 + $0x3d0] sm:$0xff]  ;;  %v3148_v12 = vld [vmem:[%s4200_s13 + $0x340] sm:$0xff] }
 0x5f2   :  { %2230 = vmatpush.bf16.msrb.mxu0 %v3163_v56  ;;  %v983_v15 = vmax.f32 %v872_v11, 0.0  ;;  %v939_v29 = vpop.f32.mrf.mxu0  ;;  %v912_v52 = vadd.f32 %v911_v28, %v551_v43  ;;  %v3140_v56 = vld [vmem:[%s4200_s13 + $0x300] sm:$0xff] }
 0x5f3   :  { %v985_v19 = vmax.f32 %v900_v13, 0.0  ;;  %2167 = vmatpush.bf16.msra.mxu2 %v3116_v10  ;;  %v940_v54 = vadd.f32 %v939_v29, %v553_v46 }
 0x5f4   :  { %v999_v22 = vpack.c.bf16 %v983_v15, %v967_v14  ;;  %2195 = vmatpush.bf16.msra.mxu3 %v3132_v8  ;;  %v970_v1 = vmax.f32 %v912_v52, 0.0 }
 0x5f5   :  { %2203 = vmatpush.bf16.msrb.mxu1 %v3146_v2  ;;  %v1001_v26 = vpack.c.bf16 %v985_v19, %v969_v17  ;;  %v972_v6 = vmax.f32 %v940_v54, 0.0 }
 0x5f6   :  { %2231 = vmatpush.bf16.msrb.mxu0 %v3162_v9  ;;  %2168 = vmatmul.bf16.vlgmr.msra.gmra.mxu2 %v999_v22 }
 0x5f7   :  { %2216 = vmatpush.bf16.msrb.mxu2 %v3155_v4  ;;  %2196 = vmatmul.bf16.vlgmr.msra.gmra.mxu3 %v1001_v26  ;;  %v925_v35 = vpop.f32.mrf.mxu2  ;;  %v3164_v4 = vld [vmem:[%s4200_s13 + $0x3c0] sm:$0xff] }
 0x5f8   :  { %2244 = vmatpush.bf16.msrb.mxu3 %v3171_v5  ;;  %v953_v37 = vpop.f32.mrf.mxu3  ;;  %v926_v9 = vadd.f32 %v925_v35, %v552_v16 }
 0x5f9   :  { %2204 = vmatpush.bf16.msrb.mxu1 %v3145_v59  ;;  %v913_v41 = vpop.f32.mrf.mxu1  ;;  %v954_v24 = vadd.f32 %v953_v37, %v554_v61 }
 0x5fa   :  { %2232 = vmatpush.bf16.msrb.mxu0 %v3161_v63  ;;  %v941_v44 = vpop.f32.mrf.mxu0  ;;  %v914_v48 = vadd.f32 %v913_v41, %v551_v43  ;;  %v971_v5 = vmax.f32 %v926_v9, 0.0 }
 0x5fb   :  { %2217 = vmatpush.bf16.msrb.mxu2 %v3154_v23  ;;  %v942_v50 = vadd.f32 %v941_v44, %v553_v46  ;;  %v973_v14 = vmax.f32 %v954_v24, 0.0 }
 0x5fc   :  { %2245 = vmatpush.bf16.msrb.mxu3 %v3170_v27  ;;  %v986_v58 = vmax.f32 %v914_v48, 0.0 }
 0x5fd   :  { %2205 = vmatpush.bf16.msrb.mxu1 %v3144_v25  ;;  %v988_v62 = vmax.f32 %v942_v50, 0.0  ;;  %v3204_v25 = vld [vmem:[%s4201_s14] ss:$0 sm:$0xff] }
 0x5fe   :  { %2233 = vmatpush.bf16.msrb.mxu0 %v3160_v30  ;;  %v1002_v10 = vpack.c.bf16 %v986_v58, %v970_v1 }
 0x5ff   :  { %2218 = vmatpush.bf16.msrb.mxu2 %v3153_v31  ;;  %v927_v55 = vpop.f32.mrf.mxu2  ;;  %v1004_v11 = vpack.c.bf16 %v988_v62, %v972_v6 }
 0x600   :  { %2246 = vmatpush.bf16.msrb.mxu3 %v3169_v32  ;;  %v955_v18 = vpop.f32.mrf.mxu3  ;;  %v928_v2 = vadd.f32 %v927_v55, %v552_v16 }
 0x601   :  { %2206 = vmatpush.bf16.msrb.mxu1 %v3143_v33  ;;  %v956_v7 = vadd.f32 %v955_v18, %v554_v61 }
 0x602   :  { %2234 = vmatpush.bf16.msrb.mxu0 %v3159_v34  ;;  %v987_v8 = vmax.f32 %v928_v2, 0.0 }
 0x603   :  { %2219 = vmatpush.bf16.msrb.mxu2 %v3152_v36  ;;  %v989_v13 = vmax.f32 %v956_v7, 0.0 }
 0x604   :  { %2247 = vmatpush.bf16.msrb.mxu3 %v3168_v38  ;;  %v1003_v15 = vpack.c.bf16 %v987_v8, %v971_v5 }
 0x605   :  { %2207 = vmatpush.bf16.msrb.mxu1 %v3142_v39  ;;  %v1005_v59 = vpack.c.bf16 %v989_v13, %v973_v14 }
 0x606   :  { %2235 = vmatpush.bf16.msrb.mxu0 %v3158_v40 }
 0x607   :  { %2220 = vmatpush.bf16.msrb.mxu2 %v3151_v42 }
 0x608   :  { %2248 = vmatpush.bf16.msrb.mxu3 %v3167_v45 }
 0x609   :  { %2208 = vmatpush.bf16.msrb.mxu1 %v3141_v47 }
 0x60a   :  { %2236 = vmatpush.bf16.msrb.mxu0 %v3157_v49 }
 0x60b   :  { %2221 = vmatpush.bf16.msrb.mxu2 %v3150_v51 }
 0x60c   :  { %2249 = vmatpush.bf16.msrb.mxu3 %v3166_v53 }
 0x60d   :  { %2209 = vmatpush.bf16.msrb.mxu1 %v3140_v56 }
 0x60e   :  { %2237 = vmatpush.bf16.msrb.mxu0 %v3156_v60 }
 0x60f   :  { %2222 = vmatpush.bf16.msrb.mxu2 %v3149_v0 }
 0x610   :  { %2250 = vmatpush.bf16.msrb.mxu3 %v3165_v3  ;;  %2210 = vmatmul.bf16.vlgmr.msrb.gmra.mxu1 %v1002_v10 }
 0x611   :  { %2238 = vmatmul.bf16.vlgmr.msrb.gmra.mxu0 %v1004_v11 }
 0x613   :  { %2223 = vmatpush.bf16.msrb.mxu2 %v3148_v12 }
 0x614   :  { %2251 = vmatpush.bf16.msrb.mxu3 %v3164_v4 }
 0x616   :  { %2224 = vmatmul.bf16.vlgmr.msrb.gmra.mxu2 %v1003_v15 }
 0x617   :  { %2252 = vmatmul.bf16.vlgmr.msrb.gmra.mxu3 %v1005_v59 }
 0x64d   :  { %v2043_v17 = vpop.f32.mrf.mxu1 }
 0x64e   :  { %v2071_v19 = vpop.f32.mrf.mxu0  ;;  %v2044_v30 = vadd.f32 %v3204_v25, %v2043_v17 }
 0x655   :  { %v2045_v23 = vpop.f32.mrf.mxu1 }
 0x656   :  { %v2073_v26 = vpop.f32.mrf.mxu0  ;;  %v2046_v37 = vadd.f32 %v3204_v25, %v2045_v23 }
 0x659   :  { %v2057_v63 = vpop.f32.mrf.mxu2 }
 0x65a   :  { %v2085_v22 = vpop.f32.mrf.mxu3  ;;  %v2058_v31 = vadd.f32 %v2057_v63, %v2044_v30 }
 0x65c   :  { %v2072_v35 = vadd.f32 %v2071_v19, %v2058_v31 }
 0x65d   :  { %v2099_v29 = vpop.f32.mrf.mxu1 }
 0x65e   :  { %v2127_v32 = vpop.f32.mrf.mxu0  ;;  %v2086_v38 = vadd.f32 %v2085_v22, %v2072_v35 }
 0x660   :  { %v2100_v42 = vadd.f32 %v2099_v29, %v2086_v38 }
 0x661   :  { %v2059_v27 = vpop.f32.mrf.mxu2 }
 0x662   :  { %v2087_v28 = vpop.f32.mrf.mxu3  ;;  %v2060_v39 = vadd.f32 %v2059_v27, %v2046_v37 }
 0x664   :  { %v2074_v43 = vadd.f32 %v2073_v26, %v2060_v39 }
 0x665   :  { %v2101_v36 = vpop.f32.mrf.mxu1 }
 0x666   :  { %v2129_v40 = vpop.f32.mrf.mxu0  ;;  %v2088_v47 = vadd.f32 %v2087_v28, %v2074_v43 }
 0x668   :  { %v2102_v49 = vadd.f32 %v2101_v36, %v2088_v47 }
 0x669   :  { %v2113_v33 = vpop.f32.mrf.mxu2 }
 0x66a   :  { %v2141_v34 = vpop.f32.mrf.mxu3  ;;  %v2114_v45 = vadd.f32 %v2113_v33, %v2100_v42 }
 0x66c   :  { %v2128_v48 = vadd.f32 %v2127_v32, %v2114_v45 }
 0x66d   :  { %v2155_v46 = vpop.f32.mrf.mxu1 }
 0x66e   :  { %v2183_v50 = vpop.f32.mrf.mxu0  ;;  %v2142_v52 = vadd.f32 %v2141_v34, %v2128_v48 }
 0x670   :  { %v2156_v56 = vadd.f32 %v2155_v46, %v2142_v52 }
 0x671   :  { %v2115_v41 = vpop.f32.mrf.mxu2 }
 0x672   :  { %v2143_v44 = vpop.f32.mrf.mxu3  ;;  %v2116_v53 = vadd.f32 %v2115_v41, %v2102_v49 }
 0x674   :  { %v2130_v16 = vadd.f32 %v2129_v40, %v2116_v53  ;;  %v3206_v53 = vld [vmem:[%s4203_s16] ss:$0 sm:$0xff]  ;;  %s3256_s16 = smov 128  }
 0x675   :  { %v2157_v55 = vpop.f32.mrf.mxu1 }
 0x676   :  { %v2144_v18 = vadd.f32 %v2143_v44, %v2130_v16  ;;  %v2185_v60 = vpop.f32.mrf.mxu0 }
 0x678   :  { %v2158_v2 = vadd.f32 %v2157_v55, %v2144_v18 }
 0x679   :  { %v2169_v51 = vpop.f32.mrf.mxu2 }
 0x67a   :  { %v2197_v54 = vpop.f32.mrf.mxu3  ;;  %v2170_v58 = vadd.f32 %v2169_v51, %v2156_v56 }
 0x67c   :  { %v2184_v62 = vadd.f32 %v2183_v50, %v2170_v58  ;;  %v3205_v50 = vld [vmem:[%s4202_s15] ss:$0 sm:$0xff]  ;;  %s3255_s15 = smov [#allocation2]  }
 0x67d   :  { %s2322_s4 = sshll.u32 %s3255_s15, 4  ;;  %s2323_s4 = int_to_ptr.vmem [resolvable:$true] %s2322_s4 }
 0x67e   :  { %v2198_v3 = vadd.f32 %v2197_v54, %v2184_v62 }
 0x681   :  { %v2171_v61 = vpop.f32.mrf.mxu2 }
 0x682   :  { %v2199_v0 = vpop.f32.mrf.mxu3  ;;  %v2172_v6 = vadd.f32 %v2171_v61, %v2158_v2 }
 0x684   :  { %v2186_v24 = vadd.f32 %v2185_v60, %v2172_v6 }
 0x686   :  { %v2200_v13 = vadd.f32 %v2199_v0, %v2186_v24 }
 0x68d   :  { %v2211_v1 = vpop.f32.mrf.mxu1 }
 0x68e   :  { %v2212_v7 = vadd.f32 %v2211_v1, %v2198_v3  ;;  %v2239_v9 = vpop.f32.mrf.mxu0 }
 0x695   :  { %v2213_v4 = vpop.f32.mrf.mxu1 }
 0x696   :  { %v2214_v14 = vadd.f32 %v2213_v4, %v2200_v13  ;;  %v2241_v63 = vpop.f32.mrf.mxu0 }
 0x699   :  { %v2225_v10 = vpop.f32.mrf.mxu2 }
 0x69a   :  { %v2226_v11 = vadd.f32 %v2225_v10, %v2212_v7  ;;  %v2253_v12 = vpop.f32.mrf.mxu3 }
 0x69c   :  { %v2240_v8 = vadd.f32 %v2239_v9, %v2226_v11 }
 0x69e   :  { %v2254_v5 = vadd.f32 %v2253_v12, %v2240_v8 }
 0x6a0   :  { %v2258_v15 = vadd.f32 %v2254_v5, %v3632_v20 }
 0x6a1   :  { %v2227_v59 = vpop.f32.mrf.mxu2 }
 0x6a2   :  { %v2228_v17 = vadd.f32 %v2227_v59, %v2214_v14  ;;  %v2262_v19 = vsel %vm68_vm0, %v2258_v15, 0.0  ;;  %v2255_v23 = vpop.f32.mrf.mxu3 }
 0x6a3   :  { %2263 = vadd.xlane.f32.xlu2 %v2262_v19 }
 0x6a4   :  { %v2242_v22 = vadd.f32 %v2241_v63, %v2228_v17 }
 0x6a6   :  { %v2256_v26 = vadd.f32 %v2255_v23, %v2242_v22 }
 0x6a8   :  { %v2259_v27 = vadd.f32 %v2256_v26, %v3634_v21 }
 0x6aa   :  { %v2265_v28 = vsel %vm68_vm0, %v2259_v27, 0.0 }
 0x6ab   :  { %2266 = vadd.xlane.f32.xlu0 %v2265_v28 }
 0x716   :  { %v2264_v25 = vpop.xlane.xlu2 %2263 }
 0x717   :  { %v2268_v29 = vmul.f32 %v2264_v25, %v3485_v57 }
 0x719   :  { %v2270_v30 = vsub.f32 %v2258_v15, %v2268_v29 }
 0x71b   :  { %v2272_v31 = vmul.f32 %v2270_v30, %v2270_v30 }
 0x71d   :  { %v2274_v20 = vsel %vm68_vm0, %v2272_v31, 0.0 }
 0x71e   :  { %v2267_v32 = vpop.xlane.xlu0 %2266  ;;  %2275 = vadd.xlane.f32.xlu2 %v2274_v20 }
 0x71f   :  { %v2269_v33 = vmul.f32 %v2267_v32, %v3485_v57 }
 0x721   :  { %v2271_v34 = vsub.f32 %v2259_v27, %v2269_v33 }
 0x723   :  { %v2273_v35 = vmul.f32 %v2271_v34, %v2271_v34 }
 0x725   :  { %v2277_v36 = vsel %vm68_vm0, %v2273_v35, 0.0 }
 0x726   :  { %2278 = vadd.xlane.f32.xlu1 %v2277_v36 }
 0x791   :  { %v2276_v21 = vpop.xlane.xlu2 %2275 }
 0x792   :  { %v2280_v37 = vmul.f32 %v2276_v21, %v3485_v57 }
 0x794   :  { %v2282_v38 = vadd.f32 1e-05, %v2280_v37 }
 0x796   :  { %3221 = vrsqrt.f32 %v2282_v38  ;;  %vm2290_vm9 = vweird.f32 %v2282_v38 }
 0x799   :  { %v2279_v39 = vpop.xlane.xlu1 %2278 }
 0x79a   :  { %v2281_v40 = vmul.f32 %v2279_v39, %v3485_v57 }
 0x79c   :  { %v3222_v41 = vpop.eup %3221  ;;  %v2283_v42 = vadd.f32 1e-05, %v2281_v40 }
 0x79d   :  { %v2285_v43 = vmul.f32 %v3222_v41, %v2282_v38  ;;  %vm2291_vm8 = vweird.f32 %v3222_v41 }
 0x79e   :  { %3223 = vrsqrt.f32 %v2283_v42  ;;  %vm2292_vm10 = vmor %vm2290_vm9, %vm2291_vm8  ;;  %vm2300_vm12 = vweird.f32 %v2283_v42 }
 0x79f   :  { %v2286_v44 = vmul.f32 %v3222_v41, %v2285_v43 }
 0x7a1   :  { %v2287_v45 = vmul.f32 0.5, %v2286_v44 }
 0x7a3   :  { %v2288_v46 = vsub.f32 1.5, %v2287_v45 }
 0x7a4   :  { %v3224_v47 = vpop.eup %3223 }
 0x7a5   :  { %v2289_v48 = vmul.f32 %v3222_v41, %v2288_v46  ;;  %v2295_v49 = vmul.f32 %v3224_v47, %v2283_v42  ;;  %vm2301_vm11 = vweird.f32 %v3224_v47 }
 0x7a6   :  { %vm2302_vm13 = vmor %vm2300_vm12, %vm2301_vm11 }
 0x7a7   :  { %v2293_v51 = vsel %vm2292_vm10, %v3222_v41, %v2289_v48  ;;  %v2296_v52 = vmul.f32 %v3224_v47, %v2295_v49 }
 0x7a8   :  { %v2304_v57 = vmul.f32 %v2293_v51, %v2270_v30 }
 0x7a9   :  { %v2297_v54 = vmul.f32 0.5, %v2296_v52 }
 0x7aa   :  { %v2309_v55 = vmul.f32 %v3205_v50, %v2304_v57 }
 0x7ab   :  { %v2298_v56 = vsub.f32 1.5, %v2297_v54 }
 0x7ac   :  { %v2314_v16 = vadd.f32 %v3206_v53, %v2309_v55 }
 0x7ad   :  { %v2299_v58 = vmul.f32 %v3224_v47, %v2298_v56 }
 0x7ae   :  { %2316 = vst.msk [vmem:[#allocation2] sm:$0xff] %vm68_vm0, %v2314_v16 }
 0x7af   :  { %v2303_v18 = vsel %vm2302_vm13, %v3224_v47, %v2299_v58 }
 0x7b0   :  { %v2305_v60 = vmul.f32 %v2303_v18, %v2271_v34 }
 0x7b2   :  { %v2310_v61 = vmul.f32 %v3205_v50, %v2305_v60 }
 0x7b4   :  { %v2315_v62 = vadd.f32 %v3206_v53, %v2310_v61 }
 0x7b6   :  { %2317 = vst.msk [vmem:[#allocation2 + $0x8] sm:$0xff] %vm68_vm0, %v2315_v62 }
 0x7b7   :  { %2330 = dma.vmem_to_hbm [thread:$0]  %s2323_s4, 256, %s2325_s28, [#allocation3], %s3256_s16, %s3256_s16, %s3257_s29  }
 0x7b8   :  { %3249 = dma.done.wait [#allocation3], 256  }
 0x7b9   :  { %3250 = vsyncadd [#allocation3], 4294967040 }
 0x7ba   :  { %2335 = vsyncpa [#allocation3], 1 }

</bundles_post_ra>
